<compile_context>
chip_gen: v5e
topology: v5e:2x2
jax: 0.10.0
libtpu: 0.0.40
codegen_flags: <defaults>
</compile_context>

<pallas_src>
import functools

import jax
import jax.numpy as jnp
import numpy as np
from jax import lax
from jax.experimental import pallas as pl
from jax.experimental.pallas import tpu as pltpu


# ---------------------------------------------------------------------------
# Kernel 1: encoder  Z = adj @ XW   (XW = X @ W hoisted to XLA, bf16 operand).
# Grid = (row tiles, K tiles).  The f32 output block is resident across the K
# axis and is used directly as the accumulator; a bf16 copy is emitted at the
# last K step for the decoder.
# ---------------------------------------------------------------------------
def encode_kernel(adj_ref, xw_ref, z_ref, zb_ref, *, tk, resident_xw):
    k = pl.program_id(1)

    @pl.when(k == 0)
    def _():
        z_ref[...] = jnp.zeros_like(z_ref)

    # adj streamed in its HBM dtype (f32 ok); the bf16 cast happens on the tile
    # (VPU work hidden under the DMA/MXU) instead of a separate XLA pass.
    a_tile = adj_ref[...].astype(jnp.bfloat16)

    if resident_xw:
        # XW kept fully resident in VMEM (constant index_map -> single DMA);
        # slice the current K slab.
        koff = pl.multiple_of(k * tk, tk)
        xw_tile = xw_ref[pl.ds(koff, tk), :]
    else:
        xw_tile = xw_ref[...]

    z_ref[...] += jnp.dot(a_tile, xw_tile, preferred_element_type=jnp.float32)

    @pl.when(k == pl.num_programs(1) - 1)
    def _():
        # LGAE's gcn_mean activation is identity; also emit the bf16 copy the
        # decoder consumes (free filler on the store slot, saves an XLA cast).
        zb_ref[...] = z_ref[...].astype(jnp.bfloat16)


# ---------------------------------------------------------------------------
# Kernel 2: decoder  A_pred = sigmoid(Z @ Z.T).  Fully parallel 2-D grid;
# contraction on the last dim of both operands (no explicit transpose).
# ---------------------------------------------------------------------------
def decode_kernel(zi_ref, zj_ref, a_ref):
    logits = lax.dot_general(
        zi_ref[...],
        zj_ref[...],
        dimension_numbers=(((1,), (1,)), ((), ())),
        preferred_element_type=jnp.float32,
    )
    # sigmoid via exp (EUP); same path as jax.nn.sigmoid.
    a_ref[...] = (1.0 / (1.0 + jnp.exp(-logits))).astype(a_ref.dtype)


# ---------------------------------------------------------------------------
# Helpers
# ---------------------------------------------------------------------------
def _round_up(n, m):
    return ((n + m - 1) // m) * m


def _pick_tile(n, preferred, max_tile=None):
    """Largest lane/MXU-friendly tile that divides n (n is a 128-multiple)."""
    for t in sorted({preferred, 2048, 1024, 512, 256, 128}, reverse=True):
        if max_tile is not None and t > max_tile:
            continue
        if 0 < t <= n and n % t == 0:
            return t
    return n  # only reachable for tiny n (< 128): full-dim block is legal


def _vmem_limit_bytes():
    """Gen-aware VMEM budget: ~64 MiB/TC on v7x, 128 MiB on v5e/v6e."""
    cap = 64 * 1024 * 1024
    try:
        cap = int(pltpu.get_tpu_info().vmem_capacity_bytes)
    except Exception:  # defensive: keep a v7x-safe default
        pass
    return max(32 * 1024 * 1024, min(int(cap * 0.75), 100 * 1024 * 1024))


def _pad2d(x, rows, cols=None):
    r, c = x.shape
    pr = rows - r
    pc = 0 if cols is None else cols - c
    if pr == 0 and pc == 0:
        return x
    return jnp.pad(x, ((0, pr), (0, pc)))


def _encode_call(adj_p, xw_p, *, tm, tk, resident_xw, vmem_limit):
    n = adj_p.shape[0]
    d = xw_p.shape[1]
    if resident_xw:
        xw_spec = pl.BlockSpec((n, d), lambda i, k: (0, 0))      # resident slab
    else:
        xw_spec = pl.BlockSpec((tk, d), lambda i, k: (k, 0))     # K-streamed
    cost = pl.CostEstimate(
        flops=2 * n * n * d,
        transcendentals=0,
        bytes_accessed=n * n * adj_p.dtype.itemsize + n * d * 2 + n * d * (4 + 2),
    )
    return pl.pallas_call(
        functools.partial(encode_kernel, tk=tk, resident_xw=resident_xw),
        out_shape=(
            jax.ShapeDtypeStruct((n, d), jnp.float32),   # Z (f32)
            jax.ShapeDtypeStruct((n, d), jnp.bfloat16),  # Z (bf16, for decoder)
        ),
        grid_spec=pltpu.PrefetchScalarGridSpec(
            num_scalar_prefetch=0,
            grid=(n // tm, n // tk),
            in_specs=[
                pl.BlockSpec((tm, tk), lambda i, k: (i, k)),  # adj tile (streamed)
                xw_spec,
            ],
            out_specs=[
                pl.BlockSpec((tm, d), lambda i, k: (i, 0)),
                pl.BlockSpec((tm, d), lambda i, k: (i, 0)),
            ],
        ),
        compiler_params=pltpu.CompilerParams(
            dimension_semantics=("parallel", "arbitrary"),
            vmem_limit_bytes=vmem_limit,
        ),
        cost_estimate=cost,
    )(adj_p, xw_p)


def _decode_call(zb, *, tm, tn, vmem_limit):
    n, d = zb.shape
    cost = pl.CostEstimate(
        flops=2 * n * n * d,
        transcendentals=n * n,
        bytes_accessed=2 * n * d * 2 + n * n * 4,
    )
    return pl.pallas_call(
        decode_kernel,
        out_shape=jax.ShapeDtypeStruct((n, n), jnp.float32),
        grid_spec=pltpu.PrefetchScalarGridSpec(
            num_scalar_prefetch=0,
            grid=(n // tm, n // tn),
            in_specs=[
                pl.BlockSpec((tm, d), lambda i, j: (i, 0)),  # Z row tile
                pl.BlockSpec((tn, d), lambda i, j: (j, 0)),  # Z "column" tile
            ],
            out_specs=pl.BlockSpec((tm, tn), lambda i, j: (i, j)),
        ),
        compiler_params=pltpu.CompilerParams(
            dimension_semantics=("parallel", "parallel"),
            vmem_limit_bytes=vmem_limit,
        ),
        cost_estimate=cost,
    )(zb, zb)


@functools.partial(jax.jit, static_argnames=("tm", "tk", "tn"))
def lgae_forward(adj, x, w, *, tm=512, tk=1024, tn=512):
    """LGAE forward: A_pred = sigmoid(Z @ Z.T), Z = adj @ (x @ W).

    adj may be passed in f32 (cast to bf16 on-tile inside the kernel) or
    pre-cast to bf16 once by the caller to further halve the dominant stream.
    """
    n = adj.shape[0]
    d = w.shape[1]
    vmem_limit = _vmem_limit_bytes()

    # Tiny pre-projection (x @ W) in plain XLA; bf16 operand for the encoder.
    xw = jnp.dot(x, w, preferred_element_type=jnp.float32).astype(jnp.bfloat16)

    # Pad N up to a multiple of 128 so tiles always divide cleanly (no
    # full-dim fallback blowing VMEM for awkward N).  Zero rows/cols are inert.
    n_pad = max(128, _round_up(n, 128))
    adj_p = _pad2d(adj, n_pad, n_pad)
    xw_p = _pad2d(xw, n_pad)

    # Tile selection.  Cap the parallel row axis so it has >= 2 grid steps
    # (v7x megacore needs multiple steps on the "parallel" axis to use both
    # TensorCores); K / column tiles stay large for long contiguous DMAs.
    row_cap = n_pad // 2 if n_pad >= 256 else n_pad
    tm_ = _pick_tile(n_pad, tm, max_tile=row_cap)
    tk_ = _pick_tile(n_pad, tk)
    tn_ = _pick_tile(n_pad, tn)

    # Keep XW fully resident only when it is small (double-buffered in VMEM).
    resident_xw = (n_pad * d * 2) <= 4 * 1024 * 1024

    z_p, zb_p = _encode_call(
        adj_p, xw_p, tm=tm_, tk=tk_, resident_xw=resident_xw, vmem_limit=vmem_limit
    )
    a_p = _decode_call(zb_p, tm=tm_, tn=tn_, vmem_limit=vmem_limit)

    if n_pad != n:
        return a_p[:n, :n], z_p[:n]
    return a_p, z_p


def glorot_init(key, input_dim, output_dim):
    """Deterministic glorot-uniform init, mirroring the torch glorot_init."""
    init_range = np.sqrt(6.0 / (input_dim + output_dim))
    u = jax.random.uniform(key, (input_dim, output_dim), dtype=jnp.float32)
    return u * 2.0 * init_range - init_range


if __name__ == "__main__":
    # LGAE: input_dim = adj.shape[0] = N; hidden1_dim = D_HID.
    N, D_HID = 256, 128

    key = jax.random.PRNGKey(0)
    k_x, k_adj, k_w = jax.random.split(key, 3)

    # Node features [N, N] (input_dim == N per LGAE.__init__).
    x = jax.random.normal(k_x, (N, N), dtype=jnp.float32)

    # Synthetic symmetric-normalized adjacency (dense stand-in for sparse adj).
    a = (jax.random.uniform(k_adj, (N, N)) < 0.05).astype(jnp.float32)
    a = jnp.maximum(a, a.T) + jnp.eye(N, dtype=jnp.float32)
    deg_inv_sqrt = 1.0 / jnp.sqrt(a.sum(axis=1))
    adj = a * deg_inv_sqrt[:, None] * deg_inv_sqrt[None, :]

    w = glorot_init(k_w, N, D_HID)

    a_pred, z = lgae_forward(adj, x, w)
    jax.block_until_ready(a_pred)

    # --- Encoder check against a precision-matched reference (bf16 operands,
    #     f32 accumulation — the same reduction the kernel performs).
    xw = jnp.dot(x, w)
    z_ref = jnp.dot(
        adj.astype(jnp.bfloat16), xw.astype(jnp.bfloat16),
        preferred_element_type=jnp.float32,
    )
    np.testing.assert_allclose(np.asarray(z), np.asarray(z_ref), rtol=1e-4, atol=1e-4)

    # --- Decoder check: reference decode applied to the kernel's Z with the
    #     same bf16 cast the encoder emits.
    zb = z.astype(jnp.bfloat16)
    a_ref = jax.nn.sigmoid(jnp.dot(zb, zb.T, preferred_element_type=jnp.float32))
    np.testing.assert_allclose(
        np.asarray(a_pred), np.asarray(a_ref), rtol=1e-4, atol=1e-4
    )

    # --- End-to-end semantic check vs. the full-f32 torch-equivalent forward
    #     (loose tolerance accounts for the intentional bf16 operand casts).
    z_f32 = adj @ xw
    a_f32 = jax.nn.sigmoid(z_f32 @ z_f32.T)
    np.testing.assert_allclose(np.asarray(a_pred), np.asarray(a_f32), atol=3e-2)

    print("KERNEL_OK")
</pallas_src>

<mosaic_0001>
module attributes {stable_mosaic.version = 11 : i64} {
  func.func @decode_kernel(%arg0: i32, %arg1: i32, %arg2: memref<128x128xbf16, #tpu.memory_space<vmem>>, %arg3: memref<256x128xbf16, #tpu.memory_space<vmem>>, %arg4: memref<128x256xf32, #tpu.memory_space<vmem>>) attributes {dimension_semantics = [#tpu.dimension_semantics<parallel>, #tpu.dimension_semantics<parallel>], iteration_bounds = array<i64: 2, 1>, scalar_prefetch = 0 : i64, scratch_operands = 0 : i64, tpu.core_type = #tpu.core_type<tc>, window_params = [{transform_indices = @transform_0, window_bounds = array<i64: 128, 128>}, {transform_indices = @transform_1, window_bounds = array<i64: 256, 128>}, {transform_indices = @transform_2, window_bounds = array<i64: 128, 256>}]} {
    %c0 = arith.constant 0 : index
    %c0_0 = arith.constant 0 : index
    %0 = vector.load %arg2[%c0, %c0_0] : memref<128x128xbf16, #tpu.memory_space<vmem>>, vector<128x128xbf16>
    %c0_1 = arith.constant 0 : index
    %c0_2 = arith.constant 0 : index
    %1 = vector.load %arg3[%c0_1, %c0_2] : memref<256x128xbf16, #tpu.memory_space<vmem>>, vector<256x128xbf16>
    %cst = arith.constant dense<0.000000e+00> : vector<128x256xf32>
    %2 = tpu.matmul %0, %1, %cst {dimension_numbers = #tpu.dot_dimension_numbers<[1], [1], [0], [0], [0, 0, 1, 0], [], []>} : vector<128x128xbf16>, vector<256x128xbf16>, vector<128x256xf32> -> vector<128x256xf32>
    %cst_3 = arith.constant 0.000000e+00 : f32
    %3 = vector.broadcast %cst_3 : f32 to vector<128x256xf32>
    %4 = arith.subf %3, %2 : vector<128x256xf32>
    %5 = math.exp %4 : vector<128x256xf32>
    %cst_4 = arith.constant 1.000000e+00 : f32
    %6 = vector.broadcast %cst_4 : f32 to vector<128x256xf32>
    %7 = arith.addf %6, %5 : vector<128x256xf32>
    %cst_5 = arith.constant 1.000000e+00 : f32
    %8 = vector.broadcast %cst_5 : f32 to vector<128x256xf32>
    %9 = arith.divf %8, %7 : vector<128x256xf32>
    %c0_6 = arith.constant 0 : index
    %c0_7 = arith.constant 0 : index
    %10 = vector.load %arg4[%c0_6, %c0_7] : memref<128x256xf32, #tpu.memory_space<vmem>>, vector<128x256xf32>
    tpu.vector_store %arg4[%c0_6, %c0_7], %9 {strides = array<i32>} : memref<128x256xf32, #tpu.memory_space<vmem>>, vector<128x256xf32>,
    return
  }
  func.func @transform_0(%arg0: i32, %arg1: i32) -> (i32, i32) {
    %c0_i32 = arith.constant 0 : i32
    %c0_i32_0 = arith.constant 0 : i32
    return %arg0, %c0_i32 : i32, i32
  }
  func.func @transform_1(%arg0: i32, %arg1: i32) -> (i32, i32) {
    %c0_i32 = arith.constant 0 : i32
    %c0_i32_0 = arith.constant 0 : i32
    return %arg1, %c0_i32 : i32, i32
  }
  func.func @transform_2(%arg0: i32, %arg1: i32) -> (i32, i32) {
    %c0_i32 = arith.constant 0 : i32
    return %arg0, %arg1 : i32, i32
  }
}

module attributes {stable_mosaic.version = 11 : i64} {
  func.func @encode_kernel(%arg0: i32, %arg1: i32, %arg2: memref<128x256xf32, #tpu.memory_space<vmem>>, %arg3: memref<256x128xbf16, #tpu.memory_space<vmem>>, %arg4: memref<128x128xf32, #tpu.memory_space<vmem>>, %arg5: memref<128x128xbf16, #tpu.memory_space<vmem>>) attributes {dimension_semantics = [#tpu.dimension_semantics<parallel>, #tpu.dimension_semantics<arbitrary>], iteration_bounds = array<i64: 2, 1>, scalar_prefetch = 0 : i64, scratch_operands = 0 : i64, tpu.core_type = #tpu.core_type<tc>, window_params = [{transform_indices = @transform_0, window_bounds = array<i64: 128, 256>}, {pipeline_mode = #tpu.pipeline_mode<synchronous>, transform_indices = @transform_1, window_bounds = array<i64: 256, 128>}, {transform_indices = @transform_2, window_bounds = array<i64: 128, 128>}, {transform_indices = @transform_3, window_bounds = array<i64: 128, 128>}]} {
    %c0_i32 = arith.constant 0 : i32
    %0 = arith.cmpi eq, %arg1, %c0_i32 : i32
    %1 = arith.extui %0 : i1 to i32
    %c0_i32_0 = arith.constant 0 : i32
    %2 = arith.cmpi ne, %1, %c0_i32_0 : i32
    scf.if %2 {
      %cst_9 = arith.constant 0.000000e+00 : f32
      %16 = vector.broadcast %cst_9 : f32 to vector<128x128xf32>
      %c0_10 = arith.constant 0 : index
      %c0_11 = arith.constant 0 : index
      %17 = vector.load %arg4[%c0_10, %c0_11] : memref<128x128xf32, #tpu.memory_space<vmem>>, vector<128x128xf32>
      tpu.vector_store %arg4[%c0_10, %c0_11], %16 {strides = array<i32>} : memref<128x128xf32, #tpu.memory_space<vmem>>, vector<128x128xf32>,
    } else {
    }
    %c0 = arith.constant 0 : index
    %c0_1 = arith.constant 0 : index
    %3 = vector.load %arg2[%c0, %c0_1] : memref<128x256xf32, #tpu.memory_space<vmem>>, vector<128x256xf32>
    %4 = arith.truncf %3 : vector<128x256xf32> to vector<128x256xbf16>
    %c256_i32 = arith.constant 256 : i32
    %5 = arith.muli %arg1, %c256_i32 : i32
    %6 = tpu.assume_multiple %5, 256 : i32
    %7 = arith.index_cast %6 : i32 to index
    %c0_2 = arith.constant 0 : index
    %8 = vector.load %arg3[%7, %c0_2] : memref<256x128xbf16, #tpu.memory_space<vmem>>, vector<256x128xbf16>
    %c0_3 = arith.constant 0 : index
    %c0_4 = arith.constant 0 : index
    %9 = vector.load %arg4[%c0_3, %c0_4] : memref<128x128xf32, #tpu.memory_space<vmem>>, vector<128x128xf32>
    %cst = arith.constant dense<0.000000e+00> : vector<128x128xf32>
    %10 = tpu.matmul %4, %8, %cst {dimension_numbers = #tpu.dot_dimension_numbers<[1], [0], [0], [1], [0, 0, 1, 1], [], []>} : vector<128x256xbf16>, vector<256x128xbf16>, vector<128x128xf32> -> vector<128x128xf32>
    %11 = arith.addf %9, %10 : vector<128x128xf32>
    %c0_5 = arith.constant 0 : index
    %c0_6 = arith.constant 0 : index
    %12 = vector.load %arg4[%c0_5, %c0_6] : memref<128x128xf32, #tpu.memory_space<vmem>>, vector<128x128xf32>
    tpu.vector_store %arg4[%c0_5, %c0_6], %11 {strides = array<i32>} : memref<128x128xf32, #tpu.memory_space<vmem>>, vector<128x128xf32>,
    %c0_i32_7 = arith.constant 0 : i32
    %13 = arith.cmpi eq, %arg1, %c0_i32_7 : i32
    %14 = arith.extui %13 : i1 to i32
    %c0_i32_8 = arith.constant 0 : i32
    %15 = arith.cmpi ne, %14, %c0_i32_8 : i32
    scf.if %15 {
      %c0_9 = arith.constant 0 : index
      %c0_10 = arith.constant 0 : index
      %16 = vector.load %arg4[%c0_9, %c0_10] : memref<128x128xf32, #tpu.memory_space<vmem>>, vector<128x128xf32>
      %17 = arith.truncf %16 : vector<128x128xf32> to vector<128x128xbf16>
      %c0_11 = arith.constant 0 : index
      %c0_12 = arith.constant 0 : index
      %18 = vector.load %arg5[%c0_11, %c0_12] : memref<128x128xbf16, #tpu.memory_space<vmem>>, vector<128x128xbf16>
      tpu.vector_store %arg5[%c0_11, %c0_12], %17 {strides = array<i32>} : memref<128x128xbf16, #tpu.memory_space<vmem>>, vector<128x128xbf16>,
    } else {
    }
    return
  }
  func.func @transform_0(%arg0: i32, %arg1: i32) -> (i32, i32) {
    %c0_i32 = arith.constant 0 : i32
    return %arg0, %arg1 : i32, i32
  }
  func.func @transform_1(%arg0: i32, %arg1: i32) -> (i32, i32) {
    %c0_i32 = arith.constant 0 : i32
    %c0_i32_0 = arith.constant 0 : i32
    %c0_i32_1 = arith.constant 0 : i32
    return %c0_i32, %c0_i32_0 : i32, i32
  }
  func.func @transform_2(%arg0: i32, %arg1: i32) -> (i32, i32) {
    %c0_i32 = arith.constant 0 : i32
    %c0_i32_0 = arith.constant 0 : i32
    return %arg0, %c0_i32 : i32, i32
  }
  func.func @transform_3(%arg0: i32, %arg1: i32) -> (i32, i32) {
    %c0_i32 = arith.constant 0 : i32
    %c0_i32_0 = arith.constant 0 : i32
    return %arg0, %c0_i32 : i32, i32
  }
}

</mosaic_0001>

<bundles_post_ra>
// kernel: lgae_forward.2
= control target key start
LH: loop header
LB: loop body
LE: loop exit
PB: predicated region body
PF: predicated region fallthrough
CT: control target
= control target key end

     0   :  { %9 = vsyncpa [#allocation3], 0  ;;  %s1282_s0 = inlined_call_operand.vmem [shape: f32[256,256], index: 0, kind: input, shape index: {}]   ;;  %s1283_s1 = inlined_call_operand.vmem [shape: bf16[256,128], index: 1, kind: input, shape index: {}]   ;;  %s1284_s2 = inlined_call_operand.hbm [shape: f32[256,128], index: 2, kind: output, shape index: {0}]   ;;  %s1285_s3 = inlined_call_operand.vmem [shape: bf16[256,128], index: 3, kind: output, shape index: {1}]  }
   0x1   :  { %11 = vsyncpa [#allocation3 + $0x1], 0  ;;  %s1064_s12 = smov 0   ;;  %s1066_s13 = smov 0  }
   0x2   :  { %s1068_s14 = smov 0   ;;  %s1070_s15 = smov 0  }
   0x3   :  { %s1072_s16 = smov 0   ;;  %s1074_s17 = smov 0  }
   0x4 LB: > { %s743_s18 = sadd.s32 4294967295, %s1040_s17   ;;  %s744_s19 = sadd.s32 4294967294, %s1040_s17   ;;  %s1040_s17 = sphi %s1074_s17, %s17_s17   ;;  %s1036_s16 = sphi %s1072_s16, %s1292_s16   ;;  %s1032_s15 = sphi %s1070_s15, %s1291_s15   ;;  %s1028_s14 = sphi %s1068_s14, %s1290_s14   ;;  %s1024_s13 = sphi %s1066_s13, %s1289_s13   ;;  %s1020_s12 = sphi %s1064_s12, %s1288_s12  }
   0x5   : > { %s29_s20 = sadd.s32 1, %s1036_s16  ;;  %s85_s21 = sadd.s32 1, %s1028_s14 }
   0x6   : > { %p31_p0 = scmp.ge.s32.totalorder %s29_s20, 2  ;;  %p95_p1 = scmp.ne.s32.totalorder %s1028_s14, %s1024_s13 }
   0x7   : > { %p96_p2 = scmp.eq.s32.totalorder %s743_s18, 1  ;;  %p101_p3 = scmp.ne.s32.totalorder %s1024_s13, %s1020_s12 }
   0x8   : > { %s1294_s20 = smov (%p31_p0, %s29_s20), 0  ;;  %p102_p5 = scmp.eq.s32.totalorder %s744_s19, 1 }
   0x9   : > { %p1104_p4 = por %p96_p2, %p95_p1  ;;  %s82_s23 = ssub.s32 %s1036_s16, %s1294_s20 }
   0xa   : > { %p747_p6 = scmp.ge.s32.totalorder %s1040_s17, 1  ;;  %p83_p7 = scmp.eq.s32.totalorder %s82_s23, 0 }
   0xb   : > { %p1111_p8 = por %p102_p5, %p101_p3  ;;  %p164_p9 = scmp.lt.s32.totalorder %s1040_s17, 3 }
   0xc   : > { %s1117_s25 = scalar_select %p83_p7, %s1028_s14, %s85_s21  }
   0xd   : > { %p165_p10 = pnand %p747_p6, %p164_p9 }
   0xe   : > { %s749_s11 = sshll.u32 (!%p165_p10), %s1032_s15, 4  ;;  %s188_s30 = sand.u32 (!%p165_p10), 1, %s1024_s13  }
   0xf   : > { %168 = sbr.rel (%p165_p10) target bundleno = 247 (0xf7), region = 28  ;;  %p200_p11 = scmp.lt.s32.totalorder (!%p165_p10), %s749_s11, 31 }
  0x10   : > { %s748_s4 = sshll.u32 (!%p165_p10), %s188_s30, 7 }
  0x11   : > { %s1211_s5 = scalar_lea.vmem (!%p165_p10), [#allocation2], %s748_s4  ;;  %s982_s4 = scalar_lea.hbm (!%p165_p10), %s1284_s2, 256 }
  0x12   : > { %s633_s21 = sshll.u32 (!%p165_p10), %s1211_s5, 4  ;;  %s634_s21 = int_to_ptr.vmem [resolvable:$true] %s633_s21 }
  0x14   : > { %v831_v0 = vld [vmem:[%s1283_s1 + $0x38] sm:$0xff]  ;;  %v830_v2 = vld [vmem:[%s1283_s1 + $0x30] sm:$0xff]  ;;  %v829_v4 = vld [vmem:[%s1283_s1 + $0x28] sm:$0xff]  ;;  %s1296_s11 = smov (!%p200_p11, %s749_s11), 31 }
  0x15   : > { %v839_v1 = vld [vmem:[%s1283_s1 + $0x78] sm:$0xff]  ;;  %434 = vmatpush.bf16.msra.mxu0 %v831_v0  ;;  %888 = vmatpush.bf16.msra.mxu2 %v831_v0  ;;  %v838_v3 = vld [vmem:[%s1283_s1 + $0x70] sm:$0xff]  ;;  %v837_v5 = vld [vmem:[%s1283_s1 + $0x68] sm:$0xff]  ;;  %s823_s7 = sshll.u32 %s1296_s11, 4  ;;  %s753_s6 = sshll.u32 %s1296_s11, 2 }
  0x16   : > { %483 = vmatpush.bf16.msra.mxu1 %v839_v1  ;;  %896 = vmatpush.bf16.msra.mxu3 %v839_v1  ;;  %v828_v6 = vld [vmem:[%s1283_s1 + $0x20] sm:$0xff]  ;;  %v827_v8 = vld [vmem:[%s1283_s1 + $0x18] sm:$0xff]  ;;  %v826_v10 = vld [vmem:[%s1283_s1 + $0x10] sm:$0xff]  ;;  %s1165_s19 = scalar_lea.vmem %s1282_s0, %s823_s7  ;;  %s1219_s9 = scalar_lea.vmem %s1285_s3, %s753_s6 }
  0x17   : > { %v836_v7 = vld [vmem:[%s1283_s1 + $0x60] sm:$0xff]  ;;  %v835_v9 = vld [vmem:[%s1283_s1 + $0x58] sm:$0xff]  ;;  %v834_v11 = vld [vmem:[%s1283_s1 + $0x50] sm:$0xff]  ;;  %s840_s11 = sshll.u32 %s1032_s15, 7  ;;  %s616_s15 = scalar_lea.sflag [#allocation3], %s188_s30 }
  0x18   : > { %v825_v12 = vld [vmem:[%s1283_s1 + $0x8] sm:$0xff]  ;;  %v824_v14 = vld [vmem:[%s1283_s1] sm:$0xff]  ;;  %v239_v17 = vld [vmem:[%s1165_s19 + $0x10] sm:$0xff] }
  0x19   : > { %435 = vmatpush.bf16.msra.mxu0 %v830_v2  ;;  %889 = vmatpush.bf16.msra.mxu2 %v830_v2  ;;  %v833_v13 = vld [vmem:[%s1283_s1 + $0x48] sm:$0xff]  ;;  %v832_v15 = vld [vmem:[%s1283_s1 + $0x40] sm:$0xff]  ;;  %v255_v19 = vld [vmem:[%s1165_s19 + $0x90] sm:$0xff] }
  0x1a   : > { %484 = vmatpush.bf16.msra.mxu1 %v838_v3  ;;  %897 = vmatpush.bf16.msra.mxu3 %v838_v3  ;;  %v237_v16 = vld [vmem:[%s1165_s19] sm:$0xff]  ;;  %v238_v20 = vld [vmem:[%s1165_s19 + $0x8] sm:$0xff]  ;;  %v240_v21 = vld [vmem:[%s1165_s19 + $0x18] sm:$0xff] }
  0x1b   : > { %v253_v18 = vld [vmem:[%s1165_s19 + $0x80] sm:$0xff]  ;;  %v254_v22 = vld [vmem:[%s1165_s19 + $0x88] sm:$0xff]  ;;  %v256_v23 = vld [vmem:[%s1165_s19 + $0x98] sm:$0xff]  ;;  %v269_v24 = vpack.c.bf16 %v239_v17, %v237_v16  ;;  %v270_v26 = vpack.c.bf16 %v240_v21, %v238_v20 }
  0x1c   : > { %v277_v25 = vpack.c.bf16 %v255_v19, %v253_v18  ;;  %v278_v27 = vpack.c.bf16 %v256_v23, %v254_v22  ;;  %v241_v28 = vld [vmem:[%s1165_s19 + $0x20] sm:$0xff]  ;;  %v243_v29 = vld [vmem:[%s1165_s19 + $0x30] sm:$0xff]  ;;  %v242_v32 = vld [vmem:[%s1165_s19 + $0x28] sm:$0xff] }
  0x1d   : > { %436 = vmatpush.bf16.msra.mxu0 %v829_v4  ;;  %890 = vmatpush.bf16.msra.mxu2 %v829_v4  ;;  %v257_v30 = vld [vmem:[%s1165_s19 + $0xa0] sm:$0xff]  ;;  %v259_v31 = vld [vmem:[%s1165_s19 + $0xb0] sm:$0xff]  ;;  %v244_v33 = vld [vmem:[%s1165_s19 + $0x38] sm:$0xff]  ;;  %v271_v36 = vpack.c.bf16 %v243_v29, %v241_v28 }
  0x1e   : > { %485 = vmatpush.bf16.msra.mxu1 %v837_v5  ;;  %898 = vmatpush.bf16.msra.mxu3 %v837_v5  ;;  %v258_v34 = vld [vmem:[%s1165_s19 + $0xa8] sm:$0xff]  ;;  %v260_v35 = vld [vmem:[%s1165_s19 + $0xb8] sm:$0xff]  ;;  %v279_v37 = vpack.c.bf16 %v259_v31, %v257_v30  ;;  %v272_v38 = vpack.c.bf16 %v244_v33, %v242_v32  ;;  %v245_v40 = vld [vmem:[%s1165_s19 + $0x40] sm:$0xff] }
  0x1f   : > { %v280_v39 = vpack.c.bf16 %v260_v35, %v258_v34  ;;  %v247_v41 = vld [vmem:[%s1165_s19 + $0x50] sm:$0xff]  ;;  %v261_v42 = vld [vmem:[%s1165_s19 + $0xc0] sm:$0xff]  ;;  %v246_v44 = vld [vmem:[%s1165_s19 + $0x48] sm:$0xff] }
  0x20   : > { %v263_v43 = vld [vmem:[%s1165_s19 + $0xd0] sm:$0xff]  ;;  %v248_v45 = vld [vmem:[%s1165_s19 + $0x58] sm:$0xff]  ;;  %v262_v46 = vld [vmem:[%s1165_s19 + $0xc8] sm:$0xff]  ;;  %v273_v48 = vpack.c.bf16 %v247_v41, %v245_v40 }
  0x21   : > { %437 = vmatpush.bf16.msra.mxu0 %v828_v6  ;;  %891 = vmatpush.bf16.msra.mxu2 %v828_v6  ;;  %v264_v47 = vld [vmem:[%s1165_s19 + $0xd8] sm:$0xff]  ;;  %v281_v49 = vpack.c.bf16 %v263_v43, %v261_v42  ;;  %v274_v50 = vpack.c.bf16 %v248_v45, %v246_v44  ;;  %v249_v52 = vld [vmem:[%s1165_s19 + $0x60] sm:$0xff]  ;;  %v251_v53 = vld [vmem:[%s1165_s19 + $0x70] sm:$0xff] }
  0x22   : > { %486 = vmatpush.bf16.msra.mxu1 %v836_v7  ;;  %899 = vmatpush.bf16.msra.mxu3 %v836_v7  ;;  %v282_v51 = vpack.c.bf16 %v264_v47, %v262_v46  ;;  %v265_v54 = vld [vmem:[%s1165_s19 + $0xe0] sm:$0xff]  ;;  %v267_v55 = vld [vmem:[%s1165_s19 + $0xf0] sm:$0xff]  ;;  %v250_v56 = vld [vmem:[%s1165_s19 + $0x68] sm:$0xff]  ;;  %v275_v60 = vpack.c.bf16 %v251_v53, %v249_v52 }
  0x23   : > { %v252_v57 = vld [vmem:[%s1165_s19 + $0x78] sm:$0xff]  ;;  %v266_v58 = vld [vmem:[%s1165_s19 + $0xe8] sm:$0xff]  ;;  %v283_v61 = vpack.c.bf16 %v267_v55, %v265_v54 }
  0x24   : > { %v268_v59 = vld [vmem:[%s1165_s19 + $0xf8] sm:$0xff]  ;;  %v276_v62 = vpack.c.bf16 %v252_v57, %v250_v56  ;;  %s632_s19 = scalar_lea.hbm %s1284_s2, %s840_s11 }
  0x25   : > { %438 = vmatpush.bf16.msra.mxu0 %v827_v8  ;;  %892 = vmatpush.bf16.msra.mxu2 %v827_v8  ;;  %v284_v63 = vpack.c.bf16 %v268_v59, %v266_v58  ;;  %s635_s23 = sshll.u32 %s632_s19, 4  ;;  %s636_s23 = int_to_ptr.hbm [resolvable:$true] %s635_s23 }
  0x26   : > { %487 = vmatpush.bf16.msra.mxu1 %v835_v9  ;;  %900 = vmatpush.bf16.msra.mxu3 %v835_v9  ;;  %s976_s26 = sshra.s32 %s636_s23, 4  ;;  %s977_s26 = int_to_ptr.hbm [resolvable:$true] %s976_s26 }
  0x27   : > { %s978_s27 = scalar_lea.hbm %s977_s26, 128  ;;  %p983_p1 = scmp.lt.s32.totalorder %s977_s26, %s1284_s2 }
  0x28   : > { %p979_p12 = scmp.ne.s32.totalorder %s977_s26, %s978_s27  ;;  %p984_p2 = scmp.lt.s32.totalorder %s982_s4, %s978_s27 }
  0x29   : > { %439 = vmatpush.bf16.msra.mxu0 %v826_v10  ;;  %893 = vmatpush.bf16.msra.mxu2 %v826_v10 }
  0x2a   : > { %488 = vmatpush.bf16.msra.mxu1 %v834_v11  ;;  %901 = vmatpush.bf16.msra.mxu3 %v834_v11  ;;  %p980_p13 = pnand %p979_p12, %p1104_p4  ;;  %p985_p3 = por %p984_p2, %p983_p1 }
  0x2c   : > { %p981_p0 = pneg %p980_p13 }
  0x2d   : > { %440 = vmatpush.bf16.msra.mxu0 %v825_v12  ;;  %894 = vmatpush.bf16.msra.mxu2 %v825_v12 }
  0x2e   : > { %489 = vmatpush.bf16.msra.mxu1 %v833_v13  ;;  %902 = vmatpush.bf16.msra.mxu3 %v833_v13  ;;  %p986_p5 = pnand %p985_p3, %p981_p0 }
  0x31   : > { %441 = vmatpush.bf16.msra.mxu0 %v824_v14  ;;  %895 = vmatpush.bf16.msra.mxu2 %v824_v14 }
  0x32   : > { %490 = vmatpush.bf16.msra.mxu1 %v832_v15  ;;  %903 = vmatpush.bf16.msra.mxu3 %v832_v15 }
  0x34   : > { %442 = vmatmul.bf16.vlgmr.msra.gmra.mxu0 %v269_v24  ;;  %462 = vmatmul.bf16.vlgmr.msra.gmra.mxu2 %v277_v25 }
  0x35   : > { %491 = vmatmul.bf16.vlgmr.msra.gmra.mxu1 %v270_v26  ;;  %511 = vmatmul.bf16.vlgmr.msra.gmra.mxu3 %v278_v27 }
  0x44   : > { %447 = vmatmul.bf16.gmra.mxu0 %v271_v36  ;;  %467 = vmatmul.bf16.gmra.mxu2 %v279_v37 }
  0x45   : > { %496 = vmatmul.bf16.gmra.mxu1 %v272_v38  ;;  %516 = vmatmul.bf16.gmra.mxu3 %v280_v39 }
  0x54   : > { %452 = vmatmul.bf16.gmra.mxu0 %v273_v48  ;;  %472 = vmatmul.bf16.gmra.mxu2 %v281_v49 }
  0x55   : > { %501 = vmatmul.bf16.gmra.mxu1 %v274_v50  ;;  %521 = vmatmul.bf16.gmra.mxu3 %v282_v51 }
  0x64   : > { %457 = vmatmul.bf16.gmra.mxu0 %v275_v60  ;;  %477 = vmatmul.bf16.gmra.mxu2 %v283_v61 }
  0x65   : > { %506 = vmatmul.bf16.gmra.mxu1 %v276_v62  ;;  %526 = vmatmul.bf16.gmra.mxu3 %v284_v63 }
  0xb1   : > { %v443_v0 = vpop.f32.mrf.mxu0 }
  0xb2   : > { %v492_v1 = vpop.f32.mrf.mxu1 }
  0xb3   : > { %v493_v2 = vadd.f32 %v492_v1, %v443_v0 }
  0xb5   : > { %548 = vst [vmem:[%s1211_s5] sm:$0xff] %v493_v2 }
  0xb7   : > { %v463_v3 = vpop.f32.mrf.mxu2 }
  0xb8   : > { %v512_v4 = vpop.f32.mrf.mxu3 }
  0xb9   : > { %v513_v5 = vadd.f32 %v512_v4, %v463_v3  ;;  %v445_v6 = vpop.f32.mrf.mxu0 }
  0xba   : > { %v494_v7 = vpop.f32.mrf.mxu1 }
  0xbb   : > { %v495_v8 = vadd.f32 %v494_v7, %v445_v6  ;;  %556 = vst [vmem:[%s1211_s5 + $0x40] sm:$0xff] %v513_v5 }
  0xbd   : > { %549 = vst [vmem:[%s1211_s5 + $0x8] sm:$0xff] %v495_v8  ;;  %v844_v9 = vpack.c.bf16 %v495_v8, %v493_v2 }
  0xbf   : > { %v465_v10 = vpop.f32.mrf.mxu2  ;;  %845 = vst [vmem:[%s1219_s9] sm:$0xff] %v844_v9  }
  0xc0   : > { %v514_v11 = vpop.f32.mrf.mxu3 }
  0xc1   : > { %v515_v12 = vadd.f32 %v514_v11, %v465_v10  ;;  %v448_v13 = vpop.f32.mrf.mxu0 }
  0xc2   : > { %v497_v14 = vpop.f32.mrf.mxu1 }
  0xc3   : > { %v498_v15 = vadd.f32 %v497_v14, %v448_v13  ;;  %557 = vst [vmem:[%s1211_s5 + $0x48] sm:$0xff] %v515_v12  ;;  %v864_v16 = vpack.c.bf16 %v515_v12, %v513_v5 }
  0xc5   : > { %884 = vst [vmem:[%s1219_s9 + $0x20] sm:$0xff] %v864_v16  }
  0xc6   : > { %550 = vst [vmem:[%s1211_s5 + $0x10] sm:$0xff] %v498_v15 }
  0xc7   : > { %v468_v17 = vpop.f32.mrf.mxu2 }
  0xc8   : > { %v517_v18 = vpop.f32.mrf.mxu3 }
  0xc9   : > { %v518_v19 = vadd.f32 %v517_v18, %v468_v17  ;;  %v450_v20 = vpop.f32.mrf.mxu0 }
  0xca   : > { %v499_v21 = vpop.f32.mrf.mxu1 }
  0xcb   : > { %v500_v22 = vadd.f32 %v499_v21, %v450_v20  ;;  %558 = vst [vmem:[%s1211_s5 + $0x50] sm:$0xff] %v518_v19 }
  0xcd   : > { %551 = vst [vmem:[%s1211_s5 + $0x18] sm:$0xff] %v500_v22  ;;  %v849_v23 = vpack.c.bf16 %v500_v22, %v498_v15 }
  0xcf   : > { %v470_v24 = vpop.f32.mrf.mxu2  ;;  %881 = vst [vmem:[%s1219_s9 + $0x8] sm:$0xff] %v849_v23  }
  0xd0   : > { %v519_v25 = vpop.f32.mrf.mxu3 }
  0xd1   : > { %v520_v26 = vadd.f32 %v519_v25, %v470_v24  ;;  %v453_v27 = vpop.f32.mrf.mxu0 }
  0xd2   : > { %v502_v28 = vpop.f32.mrf.mxu1 }
  0xd3   : > { %v503_v29 = vadd.f32 %v502_v28, %v453_v27  ;;  %559 = vst [vmem:[%s1211_s5 + $0x58] sm:$0xff] %v520_v26  ;;  %v869_v30 = vpack.c.bf16 %v520_v26, %v518_v19 }
  0xd5   : > { %885 = vst [vmem:[%s1219_s9 + $0x28] sm:$0xff] %v869_v30  }
  0xd6   : > { %552 = vst [vmem:[%s1211_s5 + $0x20] sm:$0xff] %v503_v29 }
  0xd7   : > { %v473_v31 = vpop.f32.mrf.mxu2 }
  0xd8   : > { %v522_v32 = vpop.f32.mrf.mxu3 }
  0xd9   : > { %v523_v33 = vadd.f32 %v522_v32, %v473_v31  ;;  %v455_v34 = vpop.f32.mrf.mxu0 }
  0xda   : > { %v504_v35 = vpop.f32.mrf.mxu1 }
  0xdb   : > { %v505_v36 = vadd.f32 %v504_v35, %v455_v34  ;;  %560 = vst [vmem:[%s1211_s5 + $0x60] sm:$0xff] %v523_v33 }
  0xdd   : > { %553 = vst [vmem:[%s1211_s5 + $0x28] sm:$0xff] %v505_v36  ;;  %v854_v37 = vpack.c.bf16 %v505_v36, %v503_v29 }
  0xdf   : > { %v475_v38 = vpop.f32.mrf.mxu2  ;;  %882 = vst [vmem:[%s1219_s9 + $0x10] sm:$0xff] %v854_v37  }
  0xe0   : > { %v524_v39 = vpop.f32.mrf.mxu3 }
  0xe1   : > { %v525_v40 = vadd.f32 %v524_v39, %v475_v38  ;;  %v458_v41 = vpop.f32.mrf.mxu0 }
  0xe2   : > { %v507_v42 = vpop.f32.mrf.mxu1 }
  0xe3   : > { %v508_v43 = vadd.f32 %v507_v42, %v458_v41  ;;  %561 = vst [vmem:[%s1211_s5 + $0x68] sm:$0xff] %v525_v40  ;;  %v874_v44 = vpack.c.bf16 %v525_v40, %v523_v33 }
  0xe5   : > { %886 = vst [vmem:[%s1219_s9 + $0x30] sm:$0xff] %v874_v44  }
  0xe6   : > { %554 = vst [vmem:[%s1211_s5 + $0x30] sm:$0xff] %v508_v43 }
  0xe7   : > { %v478_v45 = vpop.f32.mrf.mxu2 }
  0xe8   : > { %v527_v46 = vpop.f32.mrf.mxu3 }
  0xe9   : > { %v528_v47 = vadd.f32 %v527_v46, %v478_v45  ;;  %v460_v48 = vpop.f32.mrf.mxu0 }
  0xea   : > { %v509_v49 = vpop.f32.mrf.mxu1 }
  0xeb   : > { %v510_v50 = vadd.f32 %v509_v49, %v460_v48  ;;  %562 = vst [vmem:[%s1211_s5 + $0x70] sm:$0xff] %v528_v47 }
  0xed   : > { %555 = vst [vmem:[%s1211_s5 + $0x38] sm:$0xff] %v510_v50  ;;  %v859_v51 = vpack.c.bf16 %v510_v50, %v508_v43 }
  0xef   : > { %v480_v52 = vpop.f32.mrf.mxu2  ;;  %883 = vst [vmem:[%s1219_s9 + $0x18] sm:$0xff] %v859_v51  }
  0xf0   : > { %v529_v53 = vpop.f32.mrf.mxu3 }
  0xf1   : > { %v530_v54 = vadd.f32 %v529_v53, %v480_v52 }
  0xf3   : > { %563 = vst [vmem:[%s1211_s5 + $0x78] sm:$0xff] %v530_v54  ;;  %v879_v55 = vpack.c.bf16 %v530_v54, %v528_v47 }
  0xf4   : > { %989 = shalt.err (!%p986_p5)
}
  0xf5   : > { %s1042_s30 = smov 128   ;;  %s1043_s5 = smov 8   ;;  %887 = vst [vmem:[%s1219_s9 + $0x38] sm:$0xff] %v879_v55  }
  0xf6   : > { %904 = dma.vmem_to_hbm [thread:$0]  (%p1104_p4), %s634_s21, 2048, %s636_s23, %s616_s15, %s1042_s30, %s1042_s30, %s1043_s5  }
  0xf7 PF: > { %p910_p6 = scmp.ge.s32.totalorder %s1040_s17, 2  ;;  %s654_s8 = sand.u32 1, %s1020_s12  }
  0xf8   : > { %s655_s11 = scalar_lea.sflag [#allocation3], %s654_s8 }
  0xf9   : > { %p907_p7 = pnand %p910_p6, %p1111_p8 }
  0xfb   : > { %p908_p9 = pneg %p907_p7 }
  0xfd   : > { %1015 = dma.done.wait (%p908_p9), %s655_s11, 2048  }
  0xfe   : > { %1017 = vsyncadd (%p908_p9), %s655_s11, 4294965248  ;;  %s17_s17 = sadd.s32 1, %s1040_s17   ;;  %s1288_s12 = smov %s1024_s13 }
  0xff   : > { %p14_p10 = scmp.ge.s32.totalorder %s17_s17, 4   ;;  %s1289_s13 = smov %s1028_s14 }
 0x100   : > { %s1290_s14 = smov %s1117_s25  ;;  %s1291_s15 = smov %s1036_s16 }
 0x101   : > { %s1292_s16 = smov %s1294_s20  ;;  %16 = sbr.rel (!%p14_p10) target bundleno = 4 (0x4), region = 84 }
 0x106   :  { %669 = vsyncpa [#allocation3], 1 }
 0x107   :  { %671 = vsyncpa [#allocation3 + $0x1], 1 }

// kernel: lgae_forward.3
= control target key start
LH: loop header
LB: loop body
LE: loop exit
PB: predicated region body
PF: predicated region fallthrough
CT: control target
= control target key end

     0   :  { %7 = vsyncpa [#allocation3], 0  ;;  %s2270_s0 = inlined_call_operand.vmem [shape: bf16[256,128], index: 0, kind: input, shape index: {}, may-alias: {0,1}]   ;;  %s2271_s1 = inlined_call_operand.vmem [shape: bf16[256,128], index: 1, kind: input, shape index: {}, may-alias: {0,1}]   ;;  %s2272_s2 = inlined_call_operand.hbm [shape: f32[256,256], index: 2, kind: output, shape index: {}]  }
   0x1   :  { %9 = vsyncpa [#allocation3 + $0x1], 0  ;;  %s1654_s9 = smov 0   ;;  %s1656_s10 = smov 0  }
   0x2   :  { %s1658_s11 = smov 0   ;;  %s1660_s12 = smov 0  }
   0x3   :  { %s1662_s13 = smov 0   ;;  %s1664_s14 = smov 0  }
   0x4 LB: > { %s1219_s15 = sadd.s32 4294967295, %s1635_s14   ;;  %s1220_s16 = sadd.s32 4294967294, %s1635_s14   ;;  %s1635_s14 = sphi %s1664_s14, %s15_s14   ;;  %s1631_s13 = sphi %s1662_s13, %s2325_s13   ;;  %s1627_s12 = sphi %s1660_s12, %s2324_s12   ;;  %s1623_s11 = sphi %s1658_s11, %s2323_s11   ;;  %s1619_s10 = sphi %s1656_s10, %s2322_s10   ;;  %s1615_s9 = sphi %s1654_s9, %s2321_s9  }
   0x5   : > { %s27_s17 = sadd.s32 1, %s1631_s13  ;;  %s88_s18 = sadd.s32 1, %s1623_s11 }
   0x6   : > { %p29_p0 = scmp.ge.s32.totalorder %s27_s17, 2  ;;  %p98_p1 = scmp.ne.s32.totalorder %s1623_s11, %s1619_s10 }
   0x7   : > { %p99_p2 = scmp.eq.s32.totalorder %s1219_s15, 1  ;;  %p104_p3 = scmp.ne.s32.totalorder %s1619_s10, %s1615_s9 }
   0x8   : > { %s2327_s17 = smov (%p29_p0, %s27_s17), 0  ;;  %p105_p5 = scmp.eq.s32.totalorder %s1220_s16, 1 }
   0x9   : > { %p1694_p4 = por %p99_p2, %p98_p1  ;;  %s83_s20 = ssub.s32 %s1631_s13, %s2327_s17 }
   0xa   : > { %p1224_p6 = scmp.ge.s32.totalorder %s1635_s14, 1  ;;  %p86_p7 = scmp.eq.s32.totalorder %s83_s20, 0 }
   0xb   : > { %p1701_p8 = por %p105_p5, %p104_p3  ;;  %p141_p9 = scmp.lt.s32.totalorder %s1635_s14, 3 }
   0xc   : > { %s1707_s22 = scalar_select %p86_p7, %s1623_s11, %s88_s18  }
   0xd   : > { %p142_p10 = pnand %p1224_p6, %p141_p9 }
   0xe   : > { %s1226_s29 = sshll.u32 (!%p142_p10), %s1627_s12, 4  ;;  %s165_s24 = sand.u32 (!%p142_p10), 1, %s1619_s10  }
   0xf   : > { %145 = sbr.rel (%p142_p10) target bundleno = 367 (0x16f), region = 28  ;;  %p169_p11 = scmp.lt.s32.totalorder (!%p142_p10), %s1226_s29, 31 }
  0x10   : > { %s1802_s25 = sshll.u32 (!%p142_p10), %s165_s24, 8  ;;  %s1355_s27 = sshll.u32 (!%p142_p10), %s1627_s12, 8 }
  0x11   : > { %s1828_s26 = scalar_lea.vmem (!%p142_p10), [#allocation2], %s1802_s25  ;;  %s1127_s30 = scalar_lea.hbm (!%p142_p10), %s2272_s2, %s1355_s27 }
  0x12   : > { %s1128_s12 = sshll.u32 (!%p142_p10), %s1828_s26, 4  ;;  %s1130_s3 = sshll.u32 (!%p142_p10), %s1127_s30, 4  ;;  %s1129_s12 = int_to_ptr.vmem [resolvable:$true] %s1128_s12  ;;  %s1131_s3 = int_to_ptr.hbm [resolvable:$true] %s1130_s3 }
  0x13   : > { %s1113_s4 = scalar_lea.sflag (!%p142_p10), [#allocation3], %s165_s24  ;;  %s1571_s5 = sshra.s32 (!%p142_p10), %s1131_s3, 4  ;;  %s1572_s5 = int_to_ptr.hbm [resolvable:$true] %s1571_s5 }
  0x14   : > { %v1345_v0 = vld [vmem:[%s2271_s1 + $0x38] sm:$0xff]  ;;  %v1344_v2 = vld [vmem:[%s2271_s1 + $0x30] sm:$0xff]  ;;  %v1343_v4 = vld [vmem:[%s2271_s1 + $0x28] sm:$0xff]  ;;  %s2329_s29 = smov (!%p169_p11, %s1226_s29), 31  ;;  %s1573_s6 = scalar_lea.hbm %s1572_s5, 256 }
  0x15   : > { %v1353_v1 = vld [vmem:[%s2271_s1 + $0x78] sm:$0xff]  ;;  %374 = vmatpush.bf16.xpose.msra.mxu0 %v1345_v0  ;;  %1356 = vmatpush.bf16.xpose.msra.mxu2 %v1345_v0  ;;  %v1352_v3 = vld [vmem:[%s2271_s1 + $0x70] sm:$0xff]  ;;  %v1351_v5 = vld [vmem:[%s2271_s1 + $0x68] sm:$0xff]  ;;  %s1227_s16 = sshll.u32 %s2329_s29, 2  ;;  %p1574_p12 = scmp.ne.s32.totalorder %s1572_s5, %s1573_s6 }
  0x16   : > { %423 = vmatpush.bf16.xpose.msra.mxu1 %v1353_v1  ;;  %1364 = vmatpush.bf16.xpose.msra.mxu3 %v1353_v1  ;;  %v1342_v6 = vld [vmem:[%s2271_s1 + $0x20] sm:$0xff]  ;;  %v1341_v8 = vld [vmem:[%s2271_s1 + $0x18] sm:$0xff]  ;;  %v1340_v10 = vld [vmem:[%s2271_s1 + $0x10] sm:$0xff]  ;;  %s172_s23 = scalar_lea.vmem %s2270_s0, %s1227_s16  ;;  %s1577_s15 = scalar_lea.hbm %s2272_s2, 512 }
  0x17   : > { %v1350_v7 = vld [vmem:[%s2271_s1 + $0x60] sm:$0xff]  ;;  %v1349_v9 = vld [vmem:[%s2271_s1 + $0x58] sm:$0xff]  ;;  %v1348_v11 = vld [vmem:[%s2271_s1 + $0x50] sm:$0xff]  ;;  %p1575_p13 = pnand %p1574_p12, %p1694_p4  ;;  %p1578_p1 = scmp.lt.s32.totalorder %s1572_s5, %s2272_s2 }
  0x18   : > { %v1339_v12 = vld [vmem:[%s2271_s1 + $0x8] sm:$0xff]  ;;  %v1338_v14 = vld [vmem:[%s2271_s1] sm:$0xff]  ;;  %v1332_v20 = vld [vmem:[%s172_s23 + $0x10] sm:$0xff]  ;;  %p1579_p2 = scmp.lt.s32.totalorder %s1577_s15, %s1573_s6 }
  0x19   : > { %v1347_v13 = vld [vmem:[%s2271_s1 + $0x48] sm:$0xff]  ;;  %v1346_v15 = vld [vmem:[%s2271_s1 + $0x40] sm:$0xff]  ;;  %v1336_v21 = vld [vmem:[%s172_s23 + $0x30] sm:$0xff]  ;;  %p1576_p0 = pneg %p1575_p13 }
  0x1a   : > { %v1330_v16 = vld [vmem:[%s172_s23] sm:$0xff]  ;;  %v1331_v18 = vld [vmem:[%s172_s23 + $0x8] sm:$0xff]  ;;  %v1333_v22 = vld [vmem:[%s172_s23 + $0x18] sm:$0xff]  ;;  %p1580_p3 = por %p1579_p2, %p1578_p1 }
  0x1b   : > { %v1334_v17 = vld [vmem:[%s172_s23 + $0x20] sm:$0xff]  ;;  %v1335_v19 = vld [vmem:[%s172_s23 + $0x28] sm:$0xff]  ;;  %v1337_v23 = vld [vmem:[%s172_s23 + $0x38] sm:$0xff] }
  0x1c   : > { %p1581_p5 = pnand %p1580_p3, %p1576_p0 }
  0x1d   : > { %375 = vmatpush.bf16.xpose.msra.mxu0 %v1344_v2  ;;  %1357 = vmatpush.bf16.xpose.msra.mxu2 %v1344_v2 }
  0x1e   : > { %424 = vmatpush.bf16.xpose.msra.mxu1 %v1352_v3  ;;  %1365 = vmatpush.bf16.xpose.msra.mxu3 %v1352_v3 }
  0x25   : > { %376 = vmatpush.bf16.xpose.msra.mxu0 %v1343_v4  ;;  %1358 = vmatpush.bf16.xpose.msra.mxu2 %v1343_v4 }
  0x26   : > { %425 = vmatpush.bf16.xpose.msra.mxu1 %v1351_v5  ;;  %1366 = vmatpush.bf16.xpose.msra.mxu3 %v1351_v5 }
  0x2d   : > { %377 = vmatpush.bf16.xpose.msra.mxu0 %v1342_v6  ;;  %1359 = vmatpush.bf16.xpose.msra.mxu2 %v1342_v6 }
  0x2e   : > { %426 = vmatpush.bf16.xpose.msra.mxu1 %v1350_v7  ;;  %1367 = vmatpush.bf16.xpose.msra.mxu3 %v1350_v7 }
  0x35   : > { %378 = vmatpush.bf16.xpose.msra.mxu0 %v1341_v8  ;;  %1360 = vmatpush.bf16.xpose.msra.mxu2 %v1341_v8 }
  0x36   : > { %427 = vmatpush.bf16.xpose.msra.mxu1 %v1349_v9  ;;  %1368 = vmatpush.bf16.xpose.msra.mxu3 %v1349_v9 }
  0x3d   : > { %379 = vmatpush.bf16.xpose.msra.mxu0 %v1340_v10  ;;  %1361 = vmatpush.bf16.xpose.msra.mxu2 %v1340_v10 }
  0x3e   : > { %428 = vmatpush.bf16.xpose.msra.mxu1 %v1348_v11  ;;  %1369 = vmatpush.bf16.xpose.msra.mxu3 %v1348_v11 }
  0x45   : > { %380 = vmatpush.bf16.xpose.msra.mxu0 %v1339_v12  ;;  %1362 = vmatpush.bf16.xpose.msra.mxu2 %v1339_v12 }
  0x46   : > { %429 = vmatpush.bf16.xpose.msra.mxu1 %v1347_v13  ;;  %1370 = vmatpush.bf16.xpose.msra.mxu3 %v1347_v13 }
  0x4d   : > { %381 = vmatpush.bf16.xpose.msra.mxu0 %v1338_v14  ;;  %1363 = vmatpush.bf16.xpose.msra.mxu2 %v1338_v14 }
  0x4e   : > { %430 = vmatpush.bf16.xpose.msra.mxu1 %v1346_v15  ;;  %1371 = vmatpush.bf16.xpose.msra.mxu3 %v1346_v15 }
  0x54   : > { %382 = vmatmul.bf16.vlgmr.msra.gmra.mxu0 %v1330_v16  ;;  %402 = vmatmul.bf16.vlgmr.msra.gmra.mxu2 %v1334_v17 }
  0x55   : > { %431 = vmatmul.bf16.vlgmr.msra.gmra.mxu1 %v1330_v16  ;;  %451 = vmatmul.bf16.vlgmr.msra.gmra.mxu3 %v1334_v17 }
  0x64   : > { %387 = vmatmul.bf16.gmra.mxu0 %v1331_v18  ;;  %407 = vmatmul.bf16.gmra.mxu2 %v1335_v19 }
  0x65   : > { %436 = vmatmul.bf16.gmra.mxu1 %v1331_v18  ;;  %456 = vmatmul.bf16.gmra.mxu3 %v1335_v19 }
  0x74   : > { %392 = vmatmul.bf16.gmra.mxu0 %v1332_v20  ;;  %412 = vmatmul.bf16.gmra.mxu2 %v1336_v21 }
  0x75   : > { %441 = vmatmul.bf16.gmra.mxu1 %v1332_v20  ;;  %461 = vmatmul.bf16.gmra.mxu3 %v1336_v21 }
  0x84   : > { %397 = vmatmul.bf16.gmra.mxu0 %v1333_v22  ;;  %417 = vmatmul.bf16.gmra.mxu2 %v1337_v23 }
  0x85   : > { %446 = vmatmul.bf16.gmra.mxu1 %v1333_v22  ;;  %466 = vmatmul.bf16.gmra.mxu3 %v1337_v23 }
  0xd1   : > { %v383_v24 = vpop.f32.mrf.mxu0 }
  0xd2   : > { %v472_v25 = vsub.f32 0.0, %v383_v24  ;;  %v432_v26 = vpop.f32.mrf.mxu1 }
  0xd3   : > { %v473_v27 = vsub.f32 0.0, %v432_v26 }
  0xd4   : > { %v504_v28 = vmul.f32 1.442695, %v472_v25 }
  0xd5   : > { %v506_v29 = vmul.f32 1.442695, %v473_v27 }
  0xd6   : > { %1429 = vpow2.f32 %v504_v28 }
  0xd7   : > { %1431 = vpow2.f32 %v506_v29  ;;  %v403_v30 = vpop.f32.mrf.mxu2 }
  0xd8   : > { %v488_v31 = vsub.f32 0.0, %v403_v30  ;;  %v452_v32 = vpop.f32.mrf.mxu3 }
  0xd9   : > { %v489_v33 = vsub.f32 0.0, %v452_v32  ;;  %v385_v34 = vpop.f32.mrf.mxu0 }
  0xda   : > { %v536_v35 = vmul.f32 1.442695, %v488_v31  ;;  %v474_v36 = vsub.f32 0.0, %v385_v34  ;;  %v434_v37 = vpop.f32.mrf.mxu1 }
  0xdb   : > { %v538_v38 = vmul.f32 1.442695, %v489_v33  ;;  %v475_v39 = vsub.f32 0.0, %v434_v37 }
  0xdc   : > { %v1430_v40 = vpop.eup %1429  ;;  %1433 = vpow2.f32 %v536_v35  ;;  %v508_v41 = vmul.f32 1.442695, %v474_v36 }
  0xdd   : > { %v1432_v42 = vpop.eup %1431  ;;  %v1761_v43 = vadd.f32 1.0, %v1430_v40  ;;  %1435 = vpow2.f32 %v538_v38  ;;  %v510_v44 = vmul.f32 1.442695, %v475_v39 }
  0xde   : > { %v1763_v45 = vadd.f32 1.0, %v1432_v42  ;;  %1437 = vpow2.f32 %v508_v41 }
  0xdf   : > { %1439 = vrcp.f32 %v1761_v43  ;;  %v405_v46 = vpop.f32.mrf.mxu2  ;;  %v609_v51 = vand.u32 2147483647, %v1761_v43  ;;  %v611_v52 = vand.u32 2147483648, %v1761_v43  ;;  %vm605_vm0 = vweird.f32 %v1761_v43 }
  0xe0   : > { %1441 = vrcp.f32 %v1763_v45  ;;  %v454_v47 = vpop.f32.mrf.mxu3  ;;  %v490_v48 = vsub.f32 0.0, %v405_v46  ;;  %v624_v54 = vand.u32 2147483647, %v1763_v45  ;;  %v626_v55 = vand.u32 2147483648, %v1763_v45 }
  0xe1   : > { %1443 = vpow2.f32 %v510_v44  ;;  %v388_v49 = vpop.f32.mrf.mxu0  ;;  %v491_v57 = vsub.f32 0.0, %v454_v47  ;;  %vm620_vm1 = vweird.f32 %v1763_v45  ;;  %vm1779_vm2 = vcmp.eq.f32.partialorder %v609_v51, 8.507059e+37 }
  0xe2   : > { %v1434_v50 = vpop.eup %1433  ;;  %v476_v60 = vsub.f32 0.0, %v388_v49  ;;  %v437_v61 = vpop.f32.mrf.mxu1  ;;  %v540_v63 = vmul.f32 1.442695, %v490_v48  ;;  %v612_v3 = vor.u32 1.1754944e-38, %v611_v52  ;;  %vm1786_vm3 = vcmp.eq.f32.partialorder %v624_v54, 8.507059e+37 }
  0xe3   : > { %v1436_v53 = vpop.eup %1435  ;;  %v1771_v56 = vadd.f32 1.0, %v1434_v50  ;;  %v627_v7 = vor.u32 1.1754944e-38, %v626_v55  ;;  %v1790_v8 = vmul.f32 1.442695, %v491_v57  ;;  %v477_v9 = vsub.f32 0.0, %v437_v61 }
  0xe4   : > { %v1438_v58 = vpop.eup %1437  ;;  %v1773_v59 = vadd.f32 1.0, %v1436_v53  ;;  %v1795_v13 = vmul.f32 1.442695, %v476_v60 }
  0xe5   : > { %v1440_v62 = vpop.eup %1439  ;;  %1445 = vrcp.f32 %v1771_v56  ;;  %v849_v11 = vand.u32 2147483647, %v1771_v56  ;;  %v1793_v12 = vadd.f32 1.0, %v1438_v58  ;;  %v851_v15 = vand.u32 2147483648, %v1771_v56 }
  0xe6   : > { %v1442_v0 = vpop.eup %1441  ;;  %v601_v1 = vmul.f32 %v1440_v62, %v1761_v43  ;;  %1447 = vrcp.f32 %v1773_v59  ;;  %vm606_vm4 = vweird.f32 %v1440_v62  ;;  %vm845_vm5 = vweird.f32 %v1771_v56 }
  0xe7   : > { %v1444_v4 = vpop.eup %1443  ;;  %v616_v5 = vmul.f32 %v1442_v0, %v1763_v45  ;;  %1449 = vpow2.f32 %v540_v63  ;;  %v864_v18 = vand.u32 2147483647, %v1773_v59  ;;  %vm621_vm6 = vweird.f32 %v1442_v0  ;;  %vm607_vm9 = vmor %vm605_vm0, %vm606_vm4  ;;  %v408_v43 = vpop.f32.mrf.mxu2 }
  0xe8   : > { %v602_v10 = vsub.f32 1.0, %v601_v1  ;;  %v1798_v16 = vadd.f32 1.0, %v1444_v4  ;;  %1451 = vrcp.f32 %v1793_v12  ;;  %vm860_vm7 = vweird.f32 %v1773_v59  ;;  %vm622_vm10 = vmor %vm620_vm1, %vm621_vm6  ;;  %v457_v46 = vpop.f32.mrf.mxu3 }
  0xe9   : > { %v617_v14 = vsub.f32 1.0, %v616_v5  ;;  %v866_v21 = vand.u32 2147483648, %v1773_v59  ;;  %vm1810_vm8 = vcmp.eq.f32.partialorder %v849_v11, 8.507059e+37  ;;  %v852_v27 = vor.u32 1.1754944e-38, %v851_v15 }
  0xea   : > { %v603_v17 = vmul.f32 %v1440_v62, %v602_v10  ;;  %1453 = vrcp.f32 %v1798_v16  ;;  %v514_v29 = vmul.f32 1.442695, %v477_v9  ;;  %vm1820_vm11 = vcmp.eq.f32.partialorder %v864_v18, 8.507059e+37  ;;  %v439_v11 = vpop.f32.mrf.mxu1 }
  0xeb   : > { %v1446_v19 = vpop.eup %1445  ;;  %v618_v20 = vmul.f32 %v1442_v0, %v617_v14  ;;  %v639_v33 = vand.u32 2147483647, %v1793_v12  ;;  %v867_v38 = vor.u32 1.1754944e-38, %v866_v21  ;;  %vm635_vm14 = vweird.f32 %v1793_v12 }
  0xec   : > { %v1448_v22 = vpop.eup %1447  ;;  %v604_v23 = vadd.f32 %v1440_v62, %v603_v17  ;;  %v841_v24 = vmul.f32 %v1446_v19, %v1771_v56  ;;  %vm846_vm12 = vweird.f32 %v1446_v19  ;;  %v641_v50 = vand.u32 2147483648, %v1793_v12 }
  0xed   : > { %v619_v26 = vadd.f32 %v1442_v0, %v618_v20  ;;  %v856_v28 = vmul.f32 %v1448_v22, %v1773_v59  ;;  %v1450_v34 = vpop.eup %1449  ;;  %vm861_vm13 = vweird.f32 %v1448_v22  ;;  %vm1838_vm15 = vcmp.eq.f32.partialorder %v639_v33, 8.507059e+37  ;;  %vm847_vm0 = vmor %vm845_vm5, %vm846_vm12 }
  0xee   : > { %v608_v30 = vsel %vm607_vm9, %v1440_v62, %v604_v23  ;;  %v842_v31 = vsub.f32 1.0, %v841_v24  ;;  %v1452_v39 = vpop.eup %1451  ;;  %v1833_v42 = vadd.f32 1.0, %v1450_v34  ;;  %v654_v54 = vand.u32 2147483647, %v1798_v16  ;;  %vm862_vm1 = vmor %vm860_vm7, %vm861_vm13  ;;  %v390_v62 = vpop.f32.mrf.mxu0 }
  0xef   : > { %v613_v35 = vsel %vm1779_vm2, %v612_v3, %v608_v30  ;;  %v623_v36 = vsel %vm622_vm10, %v1442_v0, %v619_v26  ;;  %v857_v37 = vsub.f32 1.0, %v856_v28  ;;  %v631_v45 = vmul.f32 %v1452_v39, %v1793_v12  ;;  %v410_v17 = vpop.f32.mrf.mxu2 }
  0xf0   : > { %1080 = vst [vmem:[%s1828_s26] sm:$0xff] %v613_v35  ;;  %v628_v40 = vsel %vm1786_vm3, %v627_v7, %v623_v36  ;;  %v843_v41 = vmul.f32 %v1446_v19, %v842_v31  ;;  %v1454_v47 = vpop.eup %1453  ;;  %1455 = vrcp.f32 %v1833_v42  ;;  %vm636_vm2 = vweird.f32 %v1452_v39 }
  0xf1   : > { %1081 = vst [vmem:[%s1828_s26 + $0x8] sm:$0xff] %v628_v40  ;;  %v858_v44 = vmul.f32 %v1448_v22, %v857_v37  ;;  %v632_v52 = vsub.f32 1.0, %v631_v45  ;;  %v646_v53 = vmul.f32 %v1454_v47, %v1798_v16  ;;  %v656_v57 = vand.u32 2147483648, %v1798_v16  ;;  %vm637_vm4 = vmor %vm635_vm14, %vm636_vm2 }
  0xf2   : > { %v844_v48 = vadd.f32 %v1446_v19, %v843_v41  ;;  %1457 = vpow2.f32 %v1790_v8  ;;  %v642_v0 = vor.u32 1.1754944e-38, %v641_v50  ;;  %vm651_vm3 = vweird.f32 %v1454_v47 }
  0xf3   : > { %v859_v51 = vadd.f32 %v1448_v22, %v858_v44  ;;  %v633_v60 = vmul.f32 %v1452_v39, %v632_v52  ;;  %v647_v61 = vsub.f32 1.0, %v646_v53  ;;  %1459 = vpow2.f32 %v1795_v13 }
  0xf4   : > { %v848_v55 = vsel %vm847_vm0, %v1446_v19, %v844_v48  ;;  %1461 = vpow2.f32 %v514_v29  ;;  %v492_v2 = vsub.f32 0.0, %v408_v43  ;;  %vm650_vm5 = vweird.f32 %v1798_v16 }
  0xf5   : > { %v853_v56 = vsel %vm1810_vm8, %v852_v27, %v848_v55  ;;  %v863_v58 = vsel %vm862_vm1, %v1448_v22, %v859_v51  ;;  %v634_v59 = vadd.f32 %v1452_v39, %v633_v60  ;;  %v648_v1 = vmul.f32 %v1454_v47, %v647_v61  ;;  %vm652_vm7 = vmor %vm650_vm5, %vm651_vm3  ;;  %v459_v22 = vpop.f32.mrf.mxu3 }
  0xf6   : > { %1096 = vst [vmem:[%s1828_s26 + $0x80] sm:$0xff] %v853_v56  ;;  %v868_v63 = vsel %vm1820_vm11, %v867_v38, %v863_v58  ;;  %v1456_v3 = vpop.eup %1455  ;;  %vm1864_vm6 = vcmp.eq.f32.partialorder %v654_v54, 8.507059e+37  ;;  %v493_v5 = vsub.f32 0.0, %v457_v46  ;;  %v478_v6 = vsub.f32 0.0, %v390_v62  ;;  %v1912_v58 = vpop.f32.mrf.mxu0 }
  0xf7   : > { %1097 = vst [vmem:[%s1828_s26 + $0x88] sm:$0xff] %v868_v63  ;;  %v638_v7 = vsel %vm637_vm4, %v1452_v39, %v634_v59  ;;  %v649_v8 = vadd.f32 %v1454_v47, %v648_v1  ;;  %v657_v9 = vor.u32 1.1754944e-38, %v656_v57  ;;  %v871_v10 = vmul.f32 %v1456_v3, %v1833_v42 }
  0xf8   : > { %v1458_v13 = vpop.eup %1457  ;;  %v643_v12 = vsel %vm1838_vm15, %v642_v0, %v638_v7  ;;  %v881_v14 = vand.u32 2147483648, %v1833_v42  ;;  %v544_v15 = vmul.f32 1.442695, %v492_v2  ;;  %v546_v16 = vmul.f32 1.442695, %v493_v5 }
  0xf9   : > { %1082 = vst [vmem:[%s1828_s26 + $0x10] sm:$0xff] %v643_v12  ;;  %v653_v18 = vsel %vm652_vm7, %v1454_v47, %v649_v8  ;;  %v872_v19 = vsub.f32 1.0, %v871_v10  ;;  %v1874_v20 = vadd.f32 1.0, %v1458_v13  ;;  %v516_v21 = vmul.f32 1.442695, %v478_v6  ;;  %v1460_v23 = vpop.eup %1459 }
  0xfa   : > { %v658_v24 = vsel %vm1864_vm6, %v657_v9, %v653_v18  ;;  %v879_v25 = vand.u32 2147483647, %v1833_v42  ;;  %1463 = vpow2.f32 %v544_v15  ;;  %v479_v26 = vsub.f32 0.0, %v439_v11  ;;  %v1462_v27 = vpop.eup %1461 }
  0xfb   : > { %1083 = vst [vmem:[%s1828_s26 + $0x18] sm:$0xff] %v658_v24  ;;  %v873_v28 = vmul.f32 %v1456_v3, %v872_v19  ;;  %vm876_vm8 = vweird.f32 %v1456_v3  ;;  %1465 = vrcp.f32 %v1874_v20  ;;  %v494_v29 = vsub.f32 0.0, %v410_v17 }
  0xfc   : > { %v1881_v30 = vadd.f32 1.0, %v1460_v23  ;;  %v1883_v31 = vadd.f32 1.0, %v1462_v27  ;;  %1467 = vpow2.f32 %v546_v16  ;;  %v495_v32 = vsub.f32 0.0, %v459_v22 }
  0xfd   : > { %v874_v33 = vadd.f32 %v1456_v3, %v873_v28  ;;  %vm875_vm9 = vweird.f32 %v1833_v42  ;;  %v882_v34 = vor.u32 1.1754944e-38, %v881_v14  ;;  %1469 = vpow2.f32 %v516_v21 }
  0xfe   : > { %vm877_vm10 = vmor %vm875_vm9, %vm876_vm8  ;;  %v894_v35 = vand.u32 2147483647, %v1874_v20  ;;  %v896_v36 = vand.u32 2147483648, %v1874_v20  ;;  %1471 = vrcp.f32 %v1881_v30  ;;  %v518_v37 = vmul.f32 1.442695, %v479_v26 }
  0xff   : > { %v878_v38 = vsel %vm877_vm10, %v1456_v3, %v874_v33  ;;  %vm880_vm11 = vcmp.eq.f32.partialorder %v879_v25, 8.507059e+37  ;;  %1473 = vrcp.f32 %v1883_v31  ;;  %v548_v41 = vmul.f32 1.442695, %v494_v29 }
 0x100   : > { %v1464_v39 = vpop.eup %1463  ;;  %v883_v40 = vsel %vm880_vm11, %v882_v34, %v878_v38  ;;  %v1890_v43 = vmul.f32 1.442695, %v495_v32  ;;  %vm890_vm12 = vweird.f32 %v1874_v20  ;;  %v669_v44 = vand.u32 2147483647, %v1881_v30 }
 0x101   : > { %v1466_v42 = vpop.eup %1465  ;;  %1098 = vst [vmem:[%s1828_s26 + $0x90] sm:$0xff] %v883_v40  ;;  %v671_v45 = vand.u32 2147483648, %v1881_v30  ;;  %v1896_v46 = vadd.f32 1.0, %v1464_v39  ;;  %vm1899_vm13 = vcmp.eq.f32.partialorder %v894_v35, 8.507059e+37  ;;  %v897_v50 = vor.u32 1.1754944e-38, %v896_v36 }
 0x102   : > { %v1468_v47 = vpop.eup %1467  ;;  %v886_v48 = vmul.f32 %v1466_v42, %v1874_v20  ;;  %vm665_vm14 = vweird.f32 %v1881_v30  ;;  %1475 = vpow2.f32 %v518_v37  ;;  %vm680_vm15 = vweird.f32 %v1883_v31 }
 0x103   : > { %v1470_v51 = vpop.eup %1469  ;;  %v684_v52 = vand.u32 2147483647, %v1883_v31  ;;  %v686_v53 = vand.u32 2147483648, %v1883_v31  ;;  %1477 = vrcp.f32 %v1896_v46  ;;  %v1908_v57 = vadd.f32 1.0, %v1468_v47 }
 0x104   : > { %v1472_v54 = vpop.eup %1471  ;;  %v887_v55 = vsub.f32 1.0, %v886_v48  ;;  %v1910_v56 = vadd.f32 1.0, %v1470_v51  ;;  %1479 = vpow2.f32 %v548_v41  ;;  %vm891_vm0 = vweird.f32 %v1466_v42 }
 0x105   : > { %v1474_v60 = vpop.eup %1473  ;;  %v661_v61 = vmul.f32 %v1472_v54, %v1881_v30  ;;  %vm1915_vm1 = vcmp.eq.f32.partialorder %v669_v44, 8.507059e+37  ;;  %v672_v63 = vor.u32 1.1754944e-38, %v671_v45  ;;  %v909_v1 = vand.u32 2147483647, %v1896_v46  ;;  %vm892_vm4 = vmor %vm890_vm12, %vm891_vm0  ;;  %v442_v30 = vpop.f32.mrf.mxu1 }
 0x106   : > { %v888_v0 = vmul.f32 %v1466_v42, %v887_v55  ;;  %v676_v59 = vmul.f32 %v1474_v60, %v1883_v31  ;;  %1481 = vrcp.f32 %v1908_v57  ;;  %vm1922_vm2 = vcmp.eq.f32.partialorder %v684_v52, 8.507059e+37  ;;  %v413_v44 = vpop.f32.mrf.mxu2  ;;  %v462_v52 = vpop.f32.mrf.mxu3 }
 0x107   : > { %v662_v2 = vsub.f32 1.0, %v661_v61  ;;  %v687_v4 = vor.u32 1.1754944e-38, %v686_v53  ;;  %v480_v5 = vsub.f32 0.0, %v1912_v58  ;;  %vm905_vm3 = vweird.f32 %v1896_v46  ;;  %v395_v58 = vpop.f32.mrf.mxu0 }
 0x108   : > { %v1476_v6 = vpop.eup %1475  ;;  %v889_v7 = vadd.f32 %v1466_v42, %v888_v0  ;;  %v677_v8 = vsub.f32 1.0, %v676_v59  ;;  %1483 = vrcp.f32 %v1910_v56  ;;  %vm666_vm5 = vweird.f32 %v1472_v54 }
 0x109   : > { %v1478_v9 = vpop.eup %1477  ;;  %v663_v10 = vmul.f32 %v1472_v54, %v662_v2  ;;  %vm681_vm6 = vweird.f32 %v1474_v60  ;;  %v911_v11 = vand.u32 2147483648, %v1896_v46  ;;  %vm1934_vm7 = vcmp.eq.f32.partialorder %v909_v1, 8.507059e+37  ;;  %vm667_vm8 = vmor %vm665_vm14, %vm666_vm5 }
 0x10a   : > { %v1480_v13 = vpop.eup %1479  ;;  %v893_v12 = vsel %vm892_vm4, %v1466_v42, %v889_v7  ;;  %v678_v14 = vmul.f32 %v1474_v60, %v677_v8  ;;  %v901_v15 = vmul.f32 %v1478_v9, %v1896_v46  ;;  %v924_v17 = vand.u32 2147483647, %v1908_v57  ;;  %vm682_vm10 = vmor %vm680_vm15, %vm681_vm6 }
 0x10b   : > { %v898_v18 = vsel %vm1899_vm13, %v897_v50, %v893_v12  ;;  %v664_v19 = vadd.f32 %v1472_v54, %v663_v10  ;;  %v926_v20 = vand.u32 2147483648, %v1908_v57  ;;  %v699_v21 = vand.u32 2147483647, %v1910_v56 }
 0x10c   : > { %v1482_v22 = vpop.eup %1481  ;;  %1099 = vst [vmem:[%s1828_s26 + $0x98] sm:$0xff] %v898_v18  ;;  %v679_v23 = vadd.f32 %v1474_v60, %v678_v14  ;;  %v902_v24 = vsub.f32 1.0, %v901_v15  ;;  %vm906_vm9 = vweird.f32 %v1478_v9  ;;  %v1947_v25 = vadd.f32 1.0, %v1476_v6 }
 0x10d   : > { %v668_v26 = vsel %vm667_vm8, %v1472_v54, %v664_v19  ;;  %v916_v27 = vmul.f32 %v1482_v22, %v1908_v57  ;;  %v701_v28 = vand.u32 2147483648, %v1910_v56  ;;  %v1954_v29 = vadd.f32 1.0, %v1480_v13  ;;  %vm907_vm14 = vmor %vm905_vm3, %vm906_vm9 }
 0x10e   : > { %v1484_v32 = vpop.eup %1483  ;;  %v673_v33 = vsel %vm1915_vm1, %v672_v63, %v668_v26  ;;  %v683_v34 = vsel %vm682_vm10, %v1474_v60, %v679_v23  ;;  %v903_v35 = vmul.f32 %v1478_v9, %v902_v24  ;;  %1485 = vrcp.f32 %v1947_v25  ;;  %v415_v19 = vpop.f32.mrf.mxu2 }
 0x10f   : > { %1084 = vst [vmem:[%s1828_s26 + $0x20] sm:$0xff] %v673_v33  ;;  %v688_v31 = vsel %vm1922_vm2, %v687_v4, %v683_v34  ;;  %v912_v36 = vor.u32 1.1754944e-38, %v911_v11  ;;  %v917_v37 = vsub.f32 1.0, %v916_v27  ;;  %v691_v38 = vmul.f32 %v1484_v32, %v1910_v56  ;;  %v464_v24 = vpop.f32.mrf.mxu3 }
 0x110   : > { %1085 = vst [vmem:[%s1828_s26 + $0x28] sm:$0xff] %v688_v31  ;;  %v904_v39 = vadd.f32 %v1478_v9, %v903_v35  ;;  %vm920_vm11 = vweird.f32 %v1908_v57  ;;  %vm1965_vm12 = vcmp.eq.f32.partialorder %v924_v17, 8.507059e+37  ;;  %vm695_vm13 = vweird.f32 %v1910_v56 }
 0x111   : > { %v918_v41 = vmul.f32 %v1482_v22, %v917_v37  ;;  %vm921_vm15 = vweird.f32 %v1482_v22  ;;  %v692_v42 = vsub.f32 1.0, %v691_v38  ;;  %1487 = vrcp.f32 %v1954_v29 }
 0x112   : > { %v908_v45 = vsel %vm907_vm14, %v1478_v9, %v904_v39  ;;  %v927_v47 = vor.u32 1.1754944e-38, %v926_v20  ;;  %vm1974_vm0 = vcmp.eq.f32.partialorder %v699_v21, 8.507059e+37  ;;  %v702_v49 = vor.u32 1.1754944e-38, %v701_v28  ;;  %vm922_vm2 = vmor %vm920_vm11, %vm921_vm15 }
 0x113   : > { %v913_v50 = vsel %vm1934_vm7, %v912_v36, %v908_v45  ;;  %v919_v51 = vadd.f32 %v1482_v22, %v918_v41  ;;  %v693_v46 = vmul.f32 %v1484_v32, %v692_v42  ;;  %vm696_vm1 = vweird.f32 %v1484_v32 }
 0x114   : > { %v1486_v53 = vpop.eup %1485  ;;  %1100 = vst [vmem:[%s1828_s26 + $0xa0] sm:$0xff] %v913_v50  ;;  %vm710_vm3 = vweird.f32 %v1947_v25  ;;  %1489 = vpow2.f32 %v1890_v43  ;;  %v520_v54 = vmul.f32 1.442695, %v480_v5  ;;  %v481_v55 = vsub.f32 0.0, %v442_v30  ;;  %vm697_vm4 = vmor %vm695_vm13, %vm696_vm1  ;;  %v444_v5 = vpop.f32.mrf.mxu1 }
 0x115   : > { %v923_v60 = vsel %vm922_vm2, %v1482_v22, %v919_v51  ;;  %v694_v61 = vadd.f32 %v1484_v32, %v693_v46  ;;  %v706_v62 = vmul.f32 %v1486_v53, %v1947_v25  ;;  %v714_v63 = vand.u32 2147483647, %v1947_v25 }
 0x116   : > { %v928_v0 = vsel %vm1965_vm12, %v927_v47, %v923_v60  ;;  %v716_v57 = vand.u32 2147483648, %v1947_v25  ;;  %1491 = vpow2.f32 %v520_v54  ;;  %v522_v43 = vmul.f32 1.442695, %v481_v55 }
 0x117   : > { %v1488_v59 = vpop.eup %1487  ;;  %1101 = vst [vmem:[%s1828_s26 + $0xa8] sm:$0xff] %v928_v0  ;;  %v698_v1 = vsel %vm697_vm4, %v1484_v32, %v694_v61  ;;  %v707_v2 = vsub.f32 1.0, %v706_v62  ;;  %v496_v3 = vsub.f32 0.0, %v413_v44  ;;  %v497_v4 = vsub.f32 0.0, %v462_v52 }
 0x118   : > { %v703_v6 = vsel %vm1974_vm0, %v702_v49, %v698_v1  ;;  %vm711_vm5 = vweird.f32 %v1486_v53  ;;  %v931_v56 = vmul.f32 %v1488_v59, %v1954_v29  ;;  %1493 = vpow2.f32 %v522_v43 }
 0x119   : > { %1086 = vst [vmem:[%s1828_s26 + $0x30] sm:$0xff] %v703_v6  ;;  %v708_v7 = vmul.f32 %v1486_v53, %v707_v2  ;;  %v552_v8 = vmul.f32 1.442695, %v496_v3  ;;  %v554_v9 = vmul.f32 1.442695, %v497_v4  ;;  %v482_v10 = vsub.f32 0.0, %v395_v58  ;;  %vm712_vm6 = vmor %vm710_vm3, %vm711_vm5 }
 0x11a   : > { %v1490_v11 = vpop.eup %1489  ;;  %v717_v13 = vor.u32 1.1754944e-38, %v716_v57  ;;  %v932_v12 = vsub.f32 1.0, %v931_v56  ;;  %v941_v14 = vand.u32 2147483648, %v1954_v29  ;;  %v483_v15 = vsub.f32 0.0, %v444_v5 }
 0x11b   : > { %v709_v16 = vadd.f32 %v1486_v53, %v708_v7  ;;  %v2001_v17 = vadd.f32 1.0, %v1490_v11  ;;  %1495 = vpow2.f32 %v552_v8  ;;  %v524_v18 = vmul.f32 1.442695, %v482_v10 }
 0x11c   : > { %v1492_v20 = vpop.eup %1491  ;;  %v933_v21 = vmul.f32 %v1488_v59, %v932_v12  ;;  %vm936_vm7 = vweird.f32 %v1488_v59  ;;  %v939_v22 = vand.u32 2147483647, %v1954_v29  ;;  %1497 = vpow2.f32 %v554_v9 }
 0x11d   : > { %v713_v23 = vsel %vm712_vm6, %v1486_v53, %v709_v16  ;;  %vm715_vm8 = vcmp.eq.f32.partialorder %v714_v63, 8.507059e+37  ;;  %vm935_vm9 = vweird.f32 %v1954_v29  ;;  %1499 = vrcp.f32 %v2001_v17 }
 0x11e   : > { %v1494_v26 = vpop.eup %1493  ;;  %v718_v27 = vsel %vm715_vm8, %v717_v13, %v713_v23  ;;  %v934_v28 = vadd.f32 %v1488_v59, %v933_v21  ;;  %v2009_v30 = vadd.f32 1.0, %v1492_v20  ;;  %v498_v25 = vsub.f32 0.0, %v415_v19  ;;  %vm937_vm10 = vmor %vm935_vm9, %vm936_vm7 }
 0x11f   : > { %1087 = vst [vmem:[%s1828_s26 + $0x38] sm:$0xff] %v718_v27  ;;  %v942_v32 = vor.u32 1.1754944e-38, %v941_v14  ;;  %v2012_v33 = vadd.f32 1.0, %v1494_v26  ;;  %1501 = vpow2.f32 %v524_v18  ;;  %v526_v34 = vmul.f32 1.442695, %v483_v15 }
 0x120   : > { %v938_v35 = vsel %vm937_vm10, %v1488_v59, %v934_v28  ;;  %vm940_vm11 = vcmp.eq.f32.partialorder %v939_v22, 8.507059e+37  ;;  %1503 = vrcp.f32 %v2009_v30  ;;  %v499_v29 = vsub.f32 0.0, %v464_v24 }
 0x121   : > { %v1496_v31 = vpop.eup %1495  ;;  %v943_v36 = vsel %vm940_vm11, %v942_v32, %v938_v35  ;;  %v954_v37 = vand.u32 2147483647, %v2001_v17  ;;  %v956_v38 = vand.u32 2147483648, %v2001_v17  ;;  %1505 = vrcp.f32 %v2012_v33  ;;  %v447_v32 = vpop.f32.mrf.mxu1 }
 0x122   : > { %v1498_v39 = vpop.eup %1497  ;;  %1102 = vst [vmem:[%s1828_s26 + $0xb0] sm:$0xff] %v943_v36  ;;  %v2019_v40 = vadd.f32 1.0, %v1496_v31  ;;  %v556_v41 = vmul.f32 1.442695, %v498_v25  ;;  %v729_v44 = vand.u32 2147483647, %v2009_v30  ;;  %1507 = vpow2.f32 %v526_v34  ;;  %v398_v25 = vpop.f32.mrf.mxu0 }
 0x123   : > { %v1500_v42 = vpop.eup %1499  ;;  %v731_v45 = vand.u32 2147483648, %v2009_v30  ;;  %v2023_v47 = vadd.f32 1.0, %v1498_v39  ;;  %vm950_vm12 = vweird.f32 %v2001_v17  ;;  %v744_v49 = vand.u32 2147483647, %v2012_v33 }
 0x124   : > { %v946_v48 = vmul.f32 %v1500_v42, %v2001_v17  ;;  %v746_v50 = vand.u32 2147483648, %v2012_v33  ;;  %vm2029_vm13 = vcmp.eq.f32.partialorder %v954_v37, 8.507059e+37  ;;  %v957_v52 = vor.u32 1.1754944e-38, %v956_v38 }
 0x125   : > { %v1502_v51 = vpop.eup %1501  ;;  %1509 = vrcp.f32 %v2019_v40  ;;  %v558_v53 = vmul.f32 1.442695, %v499_v29  ;;  %vm725_vm14 = vweird.f32 %v2009_v30  ;;  %vm740_vm15 = vweird.f32 %v2012_v33 }
 0x126   : > { %v1504_v54 = vpop.eup %1503  ;;  %v947_v55 = vsub.f32 1.0, %v946_v48  ;;  %1511 = vrcp.f32 %v2023_v47  ;;  %vm951_vm0 = vweird.f32 %v1500_v42  ;;  %vm2038_vm1 = vcmp.eq.f32.partialorder %v729_v44, 8.507059e+37 }
 0x127   : > { %v1506_v60 = vpop.eup %1505  ;;  %v721_v61 = vmul.f32 %v1504_v54, %v2009_v30  ;;  %v732_v63 = vor.u32 1.1754944e-38, %v731_v45  ;;  %vm2043_vm2 = vcmp.eq.f32.partialorder %v744_v49, 8.507059e+37  ;;  %v747_v58 = vor.u32 1.1754944e-38, %v746_v50  ;;  %vm952_vm4 = vmor %vm950_vm12, %vm951_vm0 }
 0x128   : > { %v948_v0 = vmul.f32 %v1500_v42, %v947_v55  ;;  %v736_v57 = vmul.f32 %v1506_v60, %v2012_v33  ;;  %v1508_v59 = vpop.eup %1507  ;;  %v969_v2 = vand.u32 2147483647, %v2019_v40  ;;  %v2048_v3 = vadd.f32 1.0, %v1502_v51 }
 0x129   : > { %v722_v1 = vsub.f32 1.0, %v721_v61  ;;  %1513 = vpow2.f32 %v556_v41  ;;  %vm965_vm3 = vweird.f32 %v2019_v40  ;;  %v971_v6 = vand.u32 2147483648, %v2019_v40 }
 0x12a   : > { %v949_v4 = vadd.f32 %v1500_v42, %v948_v0  ;;  %v737_v5 = vsub.f32 1.0, %v736_v57  ;;  %1515 = vpow2.f32 %v558_v53  ;;  %vm726_vm5 = vweird.f32 %v1504_v54 }
 0x12b   : > { %v1510_v56 = vpop.eup %1509  ;;  %v723_v7 = vmul.f32 %v1504_v54, %v722_v1  ;;  %vm980_vm6 = vweird.f32 %v2023_v47  ;;  %1517 = vrcp.f32 %v2048_v3  ;;  %v2057_v8 = vadd.f32 1.0, %v1508_v59  ;;  %vm727_vm8 = vmor %vm725_vm14, %vm726_vm5  ;;  %v467_v59 = vpop.f32.mrf.mxu3 }
 0x12c   : > { %v1512_v9 = vpop.eup %1511  ;;  %v953_v10 = vsel %vm952_vm4, %v1500_v42, %v949_v4  ;;  %v738_v11 = vmul.f32 %v1506_v60, %v737_v5  ;;  %vm741_vm7 = vweird.f32 %v1506_v60  ;;  %v961_v13 = vmul.f32 %v1510_v56, %v2019_v40  ;;  %v418_v40 = vpop.f32.mrf.mxu2 }
 0x12d   : > { %v958_v12 = vsel %vm2029_vm13, %v957_v52, %v953_v10  ;;  %v724_v14 = vadd.f32 %v1504_v54, %v723_v7  ;;  %v976_v15 = vmul.f32 %v1512_v9, %v2023_v47  ;;  %v984_v16 = vand.u32 2147483647, %v2023_v47  ;;  %vm742_vm10 = vmor %vm740_vm15, %vm741_vm7  ;;  %v400_v4 = vpop.f32.mrf.mxu0  ;;  %v449_v5 = vpop.f32.mrf.mxu1 }
 0x12e   : > { %1103 = vst [vmem:[%s1828_s26 + $0xb8] sm:$0xff] %v958_v12  ;;  %v739_v17 = vadd.f32 %v1506_v60, %v738_v11  ;;  %v962_v18 = vsub.f32 1.0, %v961_v13  ;;  %vm2067_vm9 = vcmp.eq.f32.partialorder %v969_v2, 8.507059e+37  ;;  %v986_v20 = vand.u32 2147483648, %v2023_v47 }
 0x12f   : > { %v1514_v21 = vpop.eup %1513  ;;  %v728_v22 = vsel %vm727_vm8, %v1504_v54, %v724_v14  ;;  %v972_v23 = vor.u32 1.1754944e-38, %v971_v6  ;;  %v977_v24 = vsub.f32 1.0, %v976_v15  ;;  %1519 = vrcp.f32 %v2057_v8 }
 0x130   : > { %v1516_v26 = vpop.eup %1515  ;;  %v733_v27 = vsel %vm2038_vm1, %v732_v63, %v728_v22  ;;  %v743_v28 = vsel %vm742_vm10, %v1506_v60, %v739_v17  ;;  %v963_v30 = vmul.f32 %v1510_v56, %v962_v18  ;;  %vm966_vm11 = vweird.f32 %v1510_v56 }
 0x131   : > { %v1518_v34 = vpop.eup %1517  ;;  %1088 = vst [vmem:[%s1828_s26 + $0x40] sm:$0xff] %v733_v27  ;;  %v748_v33 = vsel %vm2043_vm2, %v747_v58, %v743_v28  ;;  %v978_v35 = vmul.f32 %v1512_v9, %v977_v24  ;;  %vm981_vm12 = vweird.f32 %v1512_v9  ;;  %vm2080_vm13 = vcmp.eq.f32.partialorder %v984_v16, 8.507059e+37  ;;  %vm967_vm14 = vmor %vm965_vm3, %vm966_vm11 }
 0x132   : > { %1089 = vst [vmem:[%s1828_s26 + $0x48] sm:$0xff] %v748_v33  ;;  %v964_v31 = vadd.f32 %v1510_v56, %v963_v30  ;;  %v987_v36 = vor.u32 1.1754944e-38, %v986_v20  ;;  %v751_v37 = vmul.f32 %v1518_v34, %v2048_v3  ;;  %v759_v38 = vand.u32 2147483647, %v2048_v3  ;;  %vm982_vm15 = vmor %vm980_vm6, %vm981_vm12 }
 0x133   : > { %v979_v39 = vadd.f32 %v1512_v9, %v978_v35  ;;  %v761_v41 = vand.u32 2147483648, %v2048_v3  ;;  %v2090_v42 = vadd.f32 1.0, %v1514_v21  ;;  %v2092_v44 = vadd.f32 1.0, %v1516_v26 }
 0x134   : > { %v968_v45 = vsel %vm967_vm14, %v1510_v56, %v964_v31  ;;  %v752_v48 = vsub.f32 1.0, %v751_v37  ;;  %v774_v49 = vand.u32 2147483647, %v2057_v8  ;;  %v776_v50 = vand.u32 2147483648, %v2057_v8  ;;  %v420_v22 = vpop.f32.mrf.mxu2 }
 0x135   : > { %v1520_v51 = vpop.eup %1519  ;;  %v973_v46 = vsel %vm2067_vm9, %v972_v23, %v968_v45  ;;  %v983_v52 = vsel %vm982_vm15, %v1512_v9, %v979_v39  ;;  %1521 = vrcp.f32 %v2090_v42  ;;  %v484_v53 = vsub.f32 0.0, %v398_v25 }
 0x136   : > { %1104 = vst [vmem:[%s1828_s26 + $0xc0] sm:$0xff] %v973_v46  ;;  %v988_v47 = vsel %vm2080_vm13, %v987_v36, %v983_v52  ;;  %v753_v54 = vmul.f32 %v1518_v34, %v752_v48  ;;  %vm756_vm0 = vweird.f32 %v1518_v34  ;;  %v766_v55 = vmul.f32 %v1520_v51, %v2057_v8 }
 0x137   : > { %1105 = vst [vmem:[%s1828_s26 + $0xc8] sm:$0xff] %v988_v47  ;;  %vm755_vm1 = vweird.f32 %v2048_v3  ;;  %vm770_vm2 = vweird.f32 %v2057_v8  ;;  %1523 = vrcp.f32 %v2092_v44  ;;  %vm2109_vm3 = vcmp.eq.f32.partialorder %v759_v38, 8.507059e+37  ;;  %v469_v38 = vpop.f32.mrf.mxu3 }
 0x138   : > { %v754_v60 = vadd.f32 %v1518_v34, %v753_v54  ;;  %v762_v62 = vor.u32 1.1754944e-38, %v761_v41  ;;  %v767_v63 = vsub.f32 1.0, %v766_v55  ;;  %vm757_vm4 = vmor %vm755_vm1, %vm756_vm0  ;;  %vm2113_vm5 = vcmp.eq.f32.partialorder %v774_v49, 8.507059e+37 }
 0x139   : > { %v777_v57 = vor.u32 1.1754944e-38, %v776_v50  ;;  %v528_v43 = vmul.f32 1.442695, %v484_v53  ;;  %v485_v58 = vsub.f32 0.0, %v447_v32  ;;  %vm771_vm6 = vweird.f32 %v1520_v51 }
 0x13a   : > { %v758_v1 = vsel %vm757_vm4, %v1518_v34, %v754_v60  ;;  %v768_v2 = vmul.f32 %v1520_v51, %v767_v63  ;;  %vm995_vm7 = vweird.f32 %v2090_v42  ;;  %v999_v3 = vand.u32 2147483647, %v2090_v42  ;;  %vm772_vm8 = vmor %vm770_vm2, %vm771_vm6 }
 0x13b   : > { %v1522_v6 = vpop.eup %1521  ;;  %v763_v56 = vsel %vm2109_vm3, %v762_v62, %v758_v1  ;;  %1525 = vpow2.f32 %v528_v43  ;;  %v530_v7 = vmul.f32 1.442695, %v485_v58  ;;  %v500_v9 = vsub.f32 0.0, %v418_v40 }
 0x13c   : > { %1090 = vst [vmem:[%s1828_s26 + $0x50] sm:$0xff] %v763_v56  ;;  %v769_v10 = vadd.f32 %v1520_v51, %v768_v2  ;;  %v991_v11 = vmul.f32 %v1522_v6, %v2090_v42  ;;  %v1001_v13 = vand.u32 2147483648, %v2090_v42  ;;  %v501_v12 = vsub.f32 0.0, %v467_v59 }
 0x13d   : > { %v1524_v14 = vpop.eup %1523  ;;  %1527 = vpow2.f32 %v530_v7  ;;  %v560_v15 = vmul.f32 1.442695, %v500_v9  ;;  %v486_v16 = vsub.f32 0.0, %v400_v4  ;;  %v487_v17 = vsub.f32 0.0, %v449_v5 }
 0x13e   : > { %v773_v18 = vsel %vm772_vm8, %v1520_v51, %v769_v10  ;;  %v992_v19 = vsub.f32 1.0, %v991_v11  ;;  %v1006_v20 = vmul.f32 %v1524_v14, %v2092_v44  ;;  %v1014_v21 = vand.u32 2147483647, %v2092_v44 }
 0x13f   : > { %v778_v23 = vsel %vm2113_vm5, %v777_v57, %v773_v18  ;;  %1529 = vpow2.f32 %v560_v15  ;;  %v562_v24 = vmul.f32 1.442695, %v501_v12  ;;  %v532_v26 = vmul.f32 1.442695, %v486_v16 }
 0x140   : > { %1091 = vst [vmem:[%s1828_s26 + $0x58] sm:$0xff] %v778_v23  ;;  %v993_v8 = vmul.f32 %v1522_v6, %v992_v19  ;;  %vm996_vm9 = vweird.f32 %v1522_v6  ;;  %v1007_v27 = vsub.f32 1.0, %v1006_v20  ;;  %v534_v28 = vmul.f32 1.442695, %v487_v17 }
 0x141   : > { %v1526_v30 = vpop.eup %1525  ;;  %vm1011_vm10 = vweird.f32 %v1524_v14  ;;  %v1016_v25 = vand.u32 2147483648, %v2092_v44  ;;  %1531 = vpow2.f32 %v562_v24  ;;  %v502_v32 = vsub.f32 0.0, %v420_v22  ;;  %vm997_vm11 = vmor %vm995_vm7, %vm996_vm9 }
 0x142   : > { %v994_v34 = vadd.f32 %v1522_v6, %v993_v8  ;;  %v1008_v33 = vmul.f32 %v1524_v14, %v1007_v27  ;;  %v2133_v35 = vadd.f32 1.0, %v1526_v30  ;;  %1533 = vpow2.f32 %v532_v26 }
 0x143   : > { %v1528_v29 = vpop.eup %1527  ;;  %v1002_v31 = vor.u32 1.1754944e-38, %v1001_v13  ;;  %vm1010_vm12 = vweird.f32 %v2092_v44  ;;  %1535 = vpow2.f32 %v534_v28  ;;  %vm1000_vm13 = vcmp.eq.f32.partialorder %v999_v3, 8.507059e+37 }
 0x144   : > { %v998_v36 = vsel %vm997_vm11, %v1522_v6, %v994_v34  ;;  %v1009_v37 = vadd.f32 %v1524_v14, %v1008_v33  ;;  %1537 = vrcp.f32 %v2133_v35  ;;  %vm1012_vm14 = vmor %vm1010_vm12, %vm1011_vm10  ;;  %v1017_v45 = vor.u32 1.1754944e-38, %v1016_v25 }
 0x145   : > { %v1530_v39 = vpop.eup %1529  ;;  %v1003_v41 = vsel %vm1000_vm13, %v1002_v31, %v998_v36  ;;  %v2140_v48 = vadd.f32 1.0, %v1528_v29  ;;  %v564_v42 = vmul.f32 1.442695, %v502_v32  ;;  %vm1015_vm15 = vcmp.eq.f32.partialorder %v1014_v21, 8.507059e+37 }
 0x146   : > { %1106 = vst [vmem:[%s1828_s26 + $0xd0] sm:$0xff] %v1003_v41  ;;  %v1013_v49 = vsel %vm1012_vm14, %v1524_v14, %v1009_v37  ;;  %v2143_v44 = vadd.f32 1.0, %v1530_v39  ;;  %v503_v51 = vsub.f32 0.0, %v469_v38  ;;  %v789_v53 = vand.u32 2147483647, %v2133_v35 }
 0x147   : > { %v1532_v50 = vpop.eup %1531  ;;  %v1018_v40 = vsel %vm1015_vm15, %v1017_v45, %v1013_v49  ;;  %1539 = vrcp.f32 %v2140_v48  ;;  %v791_v47 = vand.u32 2147483648, %v2133_v35  ;;  %v804_v60 = vand.u32 2147483647, %v2140_v48 }
 0x148   : > { %v1534_v46 = vpop.eup %1533  ;;  %1107 = vst [vmem:[%s1828_s26 + $0xd8] sm:$0xff] %v1018_v40  ;;  %1541 = vrcp.f32 %v2143_v44  ;;  %v2150_v54 = vadd.f32 1.0, %v1532_v50  ;;  %vm785_vm0 = vweird.f32 %v2133_v35  ;;  %v806_v63 = vand.u32 2147483648, %v2140_v48 }
 0x149   : > { %v1536_v52 = vpop.eup %1535  ;;  %1543 = vpow2.f32 %v564_v42  ;;  %v2153_v61 = vadd.f32 1.0, %v1534_v46  ;;  %v566_v0 = vmul.f32 1.442695, %v503_v51  ;;  %v1029_v57 = vand.u32 2147483647, %v2143_v44 }
 0x14a   : > { %v1538_v55 = vpop.eup %1537  ;;  %v1031_v43 = vand.u32 2147483648, %v2143_v44  ;;  %1545 = vrcp.f32 %v2150_v54  ;;  %v2161_v58 = vadd.f32 1.0, %v1536_v52  ;;  %vm2163_vm1 = vcmp.eq.f32.partialorder %v789_v53, 8.507059e+37 }
 0x14b   : > { %v781_v62 = vmul.f32 %v1538_v55, %v2133_v35  ;;  %v792_v3 = vor.u32 1.1754944e-38, %v791_v47  ;;  %1547 = vrcp.f32 %v2153_v61  ;;  %vm800_vm2 = vweird.f32 %v2140_v48 }
 0x14c   : > { %vm2170_vm3 = vcmp.eq.f32.partialorder %v804_v60, 8.507059e+37  ;;  %vm1025_vm4 = vweird.f32 %v2143_v44  ;;  %vm786_vm5 = vweird.f32 %v1538_v55  ;;  %v807_v9 = vor.u32 1.1754944e-38, %v806_v63 }
 0x14d   : > { %v1540_v59 = vpop.eup %1539  ;;  %v782_v1 = vsub.f32 1.0, %v781_v62  ;;  %vm2176_vm6 = vcmp.eq.f32.partialorder %v1029_v57, 8.507059e+37  ;;  %v1032_v12 = vor.u32 1.1754944e-38, %v1031_v43  ;;  %1549 = vrcp.f32 %v2161_v58  ;;  %vm787_vm8 = vmor %vm785_vm0, %vm786_vm5 }
 0x14e   : > { %v1542_v4 = vpop.eup %1541  ;;  %v796_v5 = vmul.f32 %v1540_v59, %v2140_v48  ;;  %vm1040_vm7 = vweird.f32 %v2150_v54  ;;  %v1044_v16 = vand.u32 2147483647, %v2150_v54  ;;  %v1046_v17 = vand.u32 2147483648, %v2150_v54 }
 0x14f   : > { %v1544_v56 = vpop.eup %1543  ;;  %v783_v7 = vmul.f32 %v1538_v55, %v782_v1  ;;  %v1021_v10 = vmul.f32 %v1542_v4, %v2143_v44  ;;  %vm801_vm9 = vweird.f32 %v1540_v59  ;;  %1551 = vpow2.f32 %v566_v0 }
 0x150   : > { %v797_v11 = vsub.f32 1.0, %v796_v5  ;;  %v1546_v18 = vpop.eup %1545  ;;  %v2186_v20 = vadd.f32 1.0, %v1544_v56  ;;  %vm1026_vm10 = vweird.f32 %v1542_v4  ;;  %vm815_vm11 = vweird.f32 %v2153_v61  ;;  %vm802_vm12 = vmor %vm800_vm2, %vm801_vm9 }
 0x151   : > { %v784_v14 = vadd.f32 %v1538_v55, %v783_v7  ;;  %v1022_v15 = vsub.f32 1.0, %v1021_v10  ;;  %v1548_v21 = vpop.eup %1547  ;;  %v1036_v24 = vmul.f32 %v1546_v18, %v2150_v54  ;;  %v819_v25 = vand.u32 2147483647, %v2153_v61  ;;  %vm1027_vm13 = vmor %vm1025_vm4, %vm1026_vm10 }
 0x152   : > { %v798_v19 = vmul.f32 %v1540_v59, %v797_v11  ;;  %v811_v27 = vmul.f32 %v1548_v21, %v2153_v61  ;;  %v821_v32 = vand.u32 2147483648, %v2153_v61  ;;  %vm1041_vm14 = vweird.f32 %v1546_v18 }
 0x153   : > { %v788_v22 = vsel %vm787_vm8, %v1538_v55, %v784_v14  ;;  %v1023_v23 = vmul.f32 %v1542_v4, %v1022_v15  ;;  %v1037_v30 = vsub.f32 1.0, %v1036_v24  ;;  %v1550_v34 = vpop.eup %1549  ;;  %1553 = vrcp.f32 %v2186_v20 }
 0x154   : > { %v793_v26 = vsel %vm2163_vm1, %v792_v3, %v788_v22  ;;  %v799_v8 = vadd.f32 %v1540_v59, %v798_v19  ;;  %v812_v35 = vsub.f32 1.0, %v811_v27  ;;  %v826_v37 = vmul.f32 %v1550_v34, %v2161_v58  ;;  %vm1042_vm1 = vmor %vm1040_vm7, %vm1041_vm14 }
 0x155   : > { %1092 = vst [vmem:[%s1828_s26 + $0x60] sm:$0xff] %v793_v26  ;;  %v1024_v28 = vadd.f32 %v1542_v4, %v1023_v23  ;;  %v1038_v36 = vmul.f32 %v1546_v18, %v1037_v30  ;;  %v1552_v38 = vpop.eup %1551  ;;  %vm2207_vm15 = vcmp.eq.f32.partialorder %v1044_v16, 8.507059e+37  ;;  %vm816_vm0 = vweird.f32 %v1548_v21 }
 0x156   : > { %v803_v33 = vsel %vm802_vm12, %v1540_v59, %v799_v8  ;;  %v813_v45 = vmul.f32 %v1548_v21, %v812_v35  ;;  %v1047_v42 = vor.u32 1.1754944e-38, %v1046_v17  ;;  %v827_v49 = vsub.f32 1.0, %v826_v37  ;;  %vm817_vm2 = vmor %vm815_vm11, %vm816_vm0 }
 0x157   : > { %v808_v29 = vsel %vm2170_vm3, %v807_v9, %v803_v33  ;;  %v1028_v31 = vsel %vm1027_vm13, %v1542_v4, %v1024_v28  ;;  %v1039_v48 = vadd.f32 %v1546_v18, %v1038_v36  ;;  %v599_v44 = vadd.f32 1.0, %v1552_v38 }
 0x158   : > { %1093 = vst [vmem:[%s1828_s26 + $0x68] sm:$0xff] %v808_v29  ;;  %v1033_v39 = vsel %vm2176_vm6, %v1032_v12, %v1028_v31  ;;  %v814_v50 = vadd.f32 %v1548_v21, %v813_v45  ;;  %v822_v40 = vor.u32 1.1754944e-38, %v821_v32  ;;  %v834_v51 = vand.u32 2147483647, %v2161_v58 }
 0x159   : > { %1108 = vst [vmem:[%s1828_s26 + $0xe0] sm:$0xff] %v1033_v39  ;;  %v836_v46 = vand.u32 2147483648, %v2161_v58  ;;  %v1043_v52 = vsel %vm1042_vm1, %v1546_v18, %v1039_v48  ;;  %v828_v53 = vmul.f32 %v1550_v34, %v827_v49  ;;  %vm831_vm3 = vweird.f32 %v1550_v34  ;;  %v1554_v47 = vpop.eup %1553 }
 0x15a   : > { %1555 = vrcp.f32 %v599_v44  ;;  %v1048_v55 = vsel %vm2207_vm15, %v1047_v42, %v1043_v52  ;;  %v818_v54 = vsel %vm817_vm2, %v1548_v21, %v814_v50  ;;  %vm820_vm4 = vcmp.eq.f32.partialorder %v819_v25, 8.507059e+37 }
 0x15b   : > { %1109 = vst [vmem:[%s1828_s26 + $0xe8] sm:$0xff] %v1048_v55  ;;  %v823_v60 = vsel %vm820_vm4, %v822_v40, %v818_v54  ;;  %v829_v62 = vadd.f32 %v1550_v34, %v828_v53  ;;  %vm830_vm5 = vweird.f32 %v2161_v58  ;;  %v1051_v63 = vmul.f32 %v1554_v47, %v2186_v20 }
 0x15c   : > { %1094 = vst [vmem:[%s1828_s26 + $0x70] sm:$0xff] %v823_v60  ;;  %vm832_vm6 = vmor %vm830_vm5, %vm831_vm3  ;;  %v837_v61 = vor.u32 1.1754944e-38, %v836_v46  ;;  %vm835_vm7 = vcmp.eq.f32.partialorder %v834_v51, 8.507059e+37  ;;  %v1061_v59 = vand.u32 2147483648, %v2186_v20  ;;  %vm1056_vm8 = vweird.f32 %v1554_v47 }
 0x15d   : > { %v833_v0 = vsel %vm832_vm6, %v1550_v34, %v829_v62  ;;  %v1052_v57 = vsub.f32 1.0, %v1051_v63  ;;  %v1059_v3 = vand.u32 2147483647, %v2186_v20  ;;  %vm1055_vm9 = vweird.f32 %v2186_v20 }
 0x15e   : > { %v838_v43 = vsel %vm835_vm7, %v837_v61, %v833_v0  ;;  %vm1057_vm10 = vmor %vm1055_vm9, %vm1056_vm8  ;;  %v1062_v5 = vor.u32 1.1754944e-38, %v1061_v59  ;;  %v1076_v7 = vand.u32 2147483648, %v599_v44  ;;  %v1074_v11 = vand.u32 2147483647, %v599_v44 }
 0x15f   : > { %1095 = vst [vmem:[%s1828_s26 + $0x78] sm:$0xff] %v838_v43  ;;  %v1053_v2 = vmul.f32 %v1554_v47, %v1052_v57  ;;  %vm1060_vm11 = vcmp.eq.f32.partialorder %v1059_v3, 8.507059e+37  ;;  %vm1070_vm13 = vweird.f32 %v599_v44 }
 0x160   : > { %v1556_v1 = vpop.eup %1555  ;;  %v1077_v12 = vor.u32 1.1754944e-38, %v1076_v7  ;;  %vm1075_vm15 = vcmp.eq.f32.partialorder %v1074_v11, 8.507059e+37 }
 0x161   : > { %v1066_v58 = vmul.f32 %v1556_v1, %v599_v44  ;;  %v1054_v4 = vadd.f32 %v1554_v47, %v1053_v2  ;;  %vm1071_vm12 = vweird.f32 %v1556_v1 }
 0x162   : > { %vm1072_vm14 = vmor %vm1070_vm13, %vm1071_vm12 }
 0x163   : > { %v1067_v6 = vsub.f32 1.0, %v1066_v58  ;;  %v1058_v56 = vsel %vm1057_vm10, %v1554_v47, %v1054_v4 }
 0x164   : > { %v1063_v9 = vsel %vm1060_vm11, %v1062_v5, %v1058_v56 }
 0x165   : > { %v1068_v10 = vmul.f32 %v1556_v1, %v1067_v6  ;;  %1110 = vst [vmem:[%s1828_s26 + $0xf0] sm:$0xff] %v1063_v9 }
 0x167   : > { %v1069_v13 = vadd.f32 %v1556_v1, %v1068_v10 }
 0x169   : > { %v1073_v14 = vsel %vm1072_vm14, %v1556_v1, %v1069_v13 }
 0x16a   : > { %v1078_v15 = vsel %vm1075_vm15, %v1077_v12, %v1073_v14 }
 0x16b   : > { %1111 = vst [vmem:[%s1828_s26 + $0xf8] sm:$0xff] %v1078_v15 }
 0x16c   : > { %1584 = shalt.err (!%p1581_p5)
}
 0x16d   : > { %s1637_s20 = smov 256   ;;  %s1638_s23 = smov 16  }
 0x16e   : > { %1372 = dma.vmem_to_hbm [thread:$0]  (%p1694_p4), %s1129_s12, 4096, %s1131_s3, %s1113_s4, %s1637_s20, %s1637_s20, %s1638_s23  }
 0x16f PF: > { %p1378_p6 = scmp.ge.s32.totalorder %s1635_s14, 2  ;;  %s1145_s24 = sand.u32 1, %s1615_s9  }
 0x170   : > { %s1146_s25 = scalar_lea.sflag [#allocation3], %s1145_s24 }
 0x171   : > { %p1375_p7 = pnand %p1378_p6, %p1701_p8 }
 0x173   : > { %p1376_p9 = pneg %p1375_p7 }
 0x175   : > { %1610 = dma.done.wait (%p1376_p9), %s1146_s25, 4096  }
 0x176   : > { %1612 = vsyncadd (%p1376_p9), %s1146_s25, 4294963200  ;;  %s15_s14 = sadd.s32 1, %s1635_s14   ;;  %s2321_s9 = smov %s1619_s10 }
 0x177   : > { %p12_p10 = scmp.ge.s32.totalorder %s15_s14, 4   ;;  %s2322_s10 = smov %s1623_s11 }
 0x178   : > { %s2323_s11 = smov %s1707_s22  ;;  %s2324_s12 = smov %s1631_s13 }
 0x179   : > { %s2325_s13 = smov %s2327_s17  ;;  %14 = sbr.rel (!%p12_p10) target bundleno = 4 (0x4), region = 66 }
 0x17e   :  { %1152 = vsyncpa [#allocation3], 1 }
 0x17f   :  { %1154 = vsyncpa [#allocation3 + $0x1], 1 }

</bundles_post_ra>
